<compile_context>
chip_gen: v7x
topology: tpu7x:2x2x1
jax: 0.10.0
libtpu: 0.0.40
codegen_flags: <defaults>
</compile_context>

<pallas_src>
import jax
import jax.numpy as jnp
from jax import lax
from jax.experimental import pallas as pl
from jax.experimental.pallas import tpu as pltpu


# ---------------------------------------------------------------------------
# Kernel helpers
# ---------------------------------------------------------------------------
def _zero_halo_border(ref):
    """Zero only the 1-element halo border of a (Hp+2, Wp+2, C) VMEM scratch.

    The interior is fully overwritten every grid step, so zeroing the whole
    buffer (previous version) wasted (Hp+2)*(Wp+2)*C stores per image on the
    scarce vector-store slot.  The interior stores never touch the border, so
    this keeps the zero-padding invariant for the 3x3 'same' convolution.
    """
    H2, W2, C = ref.shape
    zrow = jnp.zeros((1, W2, C), ref.dtype)
    ref[0:1, :, :] = zrow
    ref[H2 - 1:H2, :, :] = zrow
    zcol = jnp.zeros((H2, 1, C), ref.dtype)
    ref[:, 0:1, :] = zcol
    ref[:, W2 - 1:W2, :] = zcol


def _conv3x3_same(xp_ref, w_ref, bias, Hp, Wp):
    """3x3 'same' conv from a zero-padded bf16 (Hp+2, Wp+2, Cin) VMEM scratch.

    Per-dy split-K variant: for each of the 3 row offsets, build a
    (Hp*Wp, 3*Cin) operand from the 3 column-shifted taps and accumulate one
    MXU dot of K = 3*Cin against the matching weight slab.  3x smaller cols
    buffer and 3-piece (not 9-piece) lane concat vs. full im2col; the 3 f32
    partial-sum adds are cheap (free on v7x's in-place MRB).
    bf16 operands, f32 accumulation.  Returns (Hp*Wp, Cout) f32 (+ bias).
    """
    Cin = xp_ref.shape[-1]
    acc = None
    for dy in range(3):
        band = xp_ref[dy:dy + Hp, :, :]                           # (Hp, Wp+2, Cin) bf16
        cols = jnp.concatenate(
            [band[:, dx:dx + Wp, :].reshape(Hp * Wp, Cin) for dx in range(3)],
            axis=1)                                               # (Hp*Wp, 3*Cin) bf16
        w_band = w_ref[dy * 3 * Cin:(dy + 1) * 3 * Cin, :]        # (3*Cin, Cout) bf16
        part = jnp.dot(cols, w_band, preferred_element_type=jnp.float32)
        acc = part if acc is None else acc + part
    return acc + bias                                             # (Hp*Wp, Cout) f32


# ---------------------------------------------------------------------------
# Kernel
# ---------------------------------------------------------------------------
def _downsample_fused_kernel(x_ref, w1_ref, b1_ref, w2_ref, b2_ref, o_ref,
                             xp_ref, h1p_ref):
    # x_ref : (1, Hp, 2, Wp, 2*C) bf16 -- free reshape of the NHWC input; dim 2
    #         is the pooling-row parity, lanes [0:C)/[C:2C) are the even/odd
    #         pooling columns.
    # w*_ref: (9*Cin, Cout) bf16 im2col-packed weights;  b*_ref: (1, Cout) f32.
    # o_ref : (1, Hp*Wp, C2) f32.
    # xp_ref / h1p_ref: bf16 VMEM scratch holding the zero-bordered 3x3 halos.
    Hp = x_ref.shape[1]
    Wp = x_ref.shape[3]
    C = x_ref.shape[4] // 2
    C2 = o_ref.shape[2]

    # ---- MaxPool2d(kernel=2, stride=2), fully in-register, in bf16 ----------
    top = x_ref[0, :, 0, :, :]                             # (Hp, Wp, 2C) even rows
    bot = x_ref[0, :, 1, :, :]                             # (Hp, Wp, 2C) odd rows
    rmax = jnp.maximum(top, bot)
    pooled = jnp.maximum(rmax[:, :, :C], rmax[:, :, C:])   # (Hp, Wp, C) bf16

    # nn.Dropout(0.5) is the identity in eval mode.
    # TODO(synk): training-mode dropout randomness (pltpu.prng_*) not implemented.

    # ---- conv1 (3x3 'same') + bias + ReLU ------------------------------------
    _zero_halo_border(xp_ref)                  # border only; interior overwritten
    xp_ref[1:Hp + 1, 1:Wp + 1, :] = pooled
    h1 = _conv3x3_same(xp_ref, w1_ref, b1_ref[...], Hp, Wp)
    h1 = jnp.maximum(h1, 0.0)                  # (Hp*Wp, C2) f32

    # ---- conv2 (3x3 'same') + bias -------------------------------------------
    _zero_halo_border(h1p_ref)
    h1p_ref[1:Hp + 1, 1:Wp + 1, :] = h1.reshape(Hp, Wp, C2).astype(jnp.bfloat16)
    h2 = _conv3x3_same(h1p_ref, w2_ref, b2_ref[...], Hp, Wp)

    # ---- InstanceNorm2d (affine=False, biased var) + ReLU ---------------------
    inv_hw = 1.0 / (Hp * Wp)
    mean = jnp.sum(h2, axis=0, keepdims=True) * inv_hw             # (1, C2)
    ex2 = jnp.sum(h2 * h2, axis=0, keepdims=True) * inv_hw         # (1, C2)
    var = jnp.maximum(ex2 - mean * mean, 0.0)   # clamp f32 cancellation (no NaN)
    y = (h2 - mean) * lax.rsqrt(var + 1e-5)
    o_ref[0] = jnp.maximum(y, 0.0)                                 # (Hp*Wp, C2)


# ---------------------------------------------------------------------------
# Wrappers (layout glue only)
# ---------------------------------------------------------------------------
def downsample_block_fwd_nhwc(x_nhwc, w1, b1, w2, b2,
                              *, vmem_limit_bytes=64 * 1024 * 1024):
    """NHWC forward of DownsampleBlock (eval mode).  Use this entry point when
    chaining blocks so activations stay NHWC (no per-block HBM transposes).
    Returns (N, H//2, W//2, 2*C) float32."""
    N, H, W, C = x_nhwc.shape
    C2 = w1.shape[0]
    Hp, Wp = H // 2, W // 2

    # MaxPool2d floors odd spatial dims: drop a trailing row / column if needed.
    # Cast to bf16 before the kernel: halves the input DMA; max-pool commutes
    # with monotone bf16 rounding and the MXU operands are bf16 anyway.
    x = x_nhwc[:, :2 * Hp, :2 * Wp, :].astype(jnp.bfloat16)
    # Contiguity-preserving reshape exposing the 2x2 pool structure.
    x = x.reshape(N, Hp, 2, Wp, 2 * C)

    # im2col-packed weights: (Cout, Cin, kh, kw) -> (kh*kw*Cin, Cout), bf16 for
    # single-pass MXU; biases stay f32.
    w1p = jnp.transpose(w1, (2, 3, 1, 0)).reshape(9 * C, C2).astype(jnp.bfloat16)
    w2p = jnp.transpose(w2, (2, 3, 1, 0)).reshape(9 * C2, C2).astype(jnp.bfloat16)
    b1p = b1.reshape(1, C2).astype(jnp.float32)
    b2p = b2.reshape(1, C2).astype(jnp.float32)

    out = pl.pallas_call(
        _downsample_fused_kernel,
        out_shape=jax.ShapeDtypeStruct((N, Hp * Wp, C2), jnp.float32),
        grid=(N,),
        in_specs=[
            pl.BlockSpec((1, Hp, 2, Wp, 2 * C), lambda n: (n, 0, 0, 0, 0)),
            pl.BlockSpec((9 * C, C2), lambda n: (0, 0)),
            pl.BlockSpec((1, C2), lambda n: (0, 0)),
            pl.BlockSpec((9 * C2, C2), lambda n: (0, 0)),
            pl.BlockSpec((1, C2), lambda n: (0, 0)),
        ],
        out_specs=pl.BlockSpec((1, Hp * Wp, C2), lambda n: (n, 0, 0)),
        scratch_shapes=[
            pltpu.VMEM((Hp + 2, Wp + 2, C), jnp.bfloat16),
            pltpu.VMEM((Hp + 2, Wp + 2, C2), jnp.bfloat16),
        ],
        compiler_params=pltpu.CompilerParams(
            dimension_semantics=("parallel",),
            vmem_limit_bytes=vmem_limit_bytes),
    )(x, w1p, b1p, w2p, b2p)

    return out.reshape(N, Hp, Wp, C2)


def downsample_block_fwd(x_nchw, w1, b1, w2, b2):
    """PyTorch-module-compatible NCHW interface (eval mode)."""
    x_nhwc = jnp.transpose(x_nchw, (0, 2, 3, 1))
    y = downsample_block_fwd_nhwc(x_nhwc, w1, b1, w2, b2)
    return jnp.transpose(y, (0, 3, 1, 2))


# ---------------------------------------------------------------------------
# Pure-JAX reference (for numerical verification)
# ---------------------------------------------------------------------------
def _reference(x, w1, b1, w2, b2, mxu_dtype=jnp.float32):
    """f32 reference; with mxu_dtype=bf16 the conv inputs are rounded to bf16
    exactly like the kernel's MXU operands (f32 accumulation in both)."""
    N, C, H, W = x.shape
    Hp, Wp = H // 2, W // 2
    xc = x[:, :, :2 * Hp, :2 * Wp]
    pooled = xc.reshape(N, C, Hp, 2, Wp, 2).max(axis=(3, 5))
    dn = ("NCHW", "OIHW", "NCHW")

    def conv(inp, w, b):
        out = lax.conv_general_dilated(
            inp.astype(mxu_dtype), w.astype(mxu_dtype), (1, 1), "SAME",
            dimension_numbers=dn, preferred_element_type=jnp.float32,
            precision=lax.Precision.HIGHEST)
        return out + b[None, :, None, None]

    h1 = jnp.maximum(conv(pooled, w1, b1), 0.0)
    h2 = conv(h1, w2, b2)
    mean = h2.mean(axis=(2, 3), keepdims=True)
    var = ((h2 - mean) ** 2).mean(axis=(2, 3), keepdims=True)
    h2 = (h2 - mean) * lax.rsqrt(var + 1e-5)
    return jnp.maximum(h2, 0.0)


# ---------------------------------------------------------------------------
if __name__ == "__main__":
    key = jax.random.PRNGKey(0)
    kx, k1, k2, k3, k4 = jax.random.split(key, 5)

    N, C, H, W = 2, 4, 16, 16
    C2 = 2 * C

    x = jax.random.normal(kx, (N, C, H, W), jnp.float32)
    # deterministic synthetic parameters (shapes from the module __init__)
    w1 = jax.random.normal(k1, (C2, C, 3, 3), jnp.float32) * 0.2
    b1 = jax.random.normal(k2, (C2,), jnp.float32) * 0.1
    w2 = jax.random.normal(k3, (C2, C2, 3, 3), jnp.float32) * 0.2
    b2 = jax.random.normal(k4, (C2,), jnp.float32) * 0.1

    out = jax.jit(downsample_block_fwd)(x, w1, b1, w2, b2)
    out = jax.block_until_ready(out)
    assert out.shape == (N, C2, H // 2, W // 2), out.shape

    # Tight check vs. a reference whose conv inputs are bf16-rounded exactly
    # like the kernel's MXU operands (f32 accumulation in both).
    ref_bf16 = _reference(x, w1, b1, w2, b2, mxu_dtype=jnp.bfloat16)
    err_tight = float(jnp.max(jnp.abs(out - ref_bf16)))
    if not bool(jnp.allclose(out, ref_bf16, atol=5e-3, rtol=5e-3)):
        raise AssertionError(
            f"mismatch vs bf16-matched reference, max abs err = {err_tight}")

    # Coarse sanity bound vs. the full-f32 reference (difference is bounded by
    # bf16 input rounding of the MXU operands).
    ref_f32 = _reference(x, w1, b1, w2, b2, mxu_dtype=jnp.float32)
    err_f32 = float(jnp.max(jnp.abs(out - ref_f32)))
    if err_f32 > 1e-1:
        raise AssertionError(
            f"mismatch vs f32 reference, max abs err = {err_f32}")

    print("KERNEL_OK")
</pallas_src>

<mosaic_0001>
module attributes {stable_mosaic.version = 11 : i64} {
  func.func @_downsample_fused_kernel(%arg0: i32, %arg1: memref<1x8x2x8x8xbf16, #tpu.memory_space<vmem>>, %arg2: memref<36x8xbf16, #tpu.memory_space<vmem>>, %arg3: memref<1x8xf32, #tpu.memory_space<vmem>>, %arg4: memref<72x8xbf16, #tpu.memory_space<vmem>>, %arg5: memref<1x8xf32, #tpu.memory_space<vmem>>, %arg6: memref<1x64x8xf32, #tpu.memory_space<vmem>>, %arg7: memref<10x10x4xbf16, #tpu.memory_space<vmem>>, %arg8: memref<10x10x8xbf16, #tpu.memory_space<vmem>>) attributes {dimension_semantics = [#tpu.dimension_semantics<parallel>], iteration_bounds = array<i64: 2>, scalar_prefetch = 0 : i64, scratch_operands = 2 : i64, tpu.core_type = #tpu.core_type<tc>, window_params = [{transform_indices = @transform_0, window_bounds = array<i64: 1, 8, 2, 8, 8>}, {pipeline_mode = #tpu.pipeline_mode<synchronous>, transform_indices = @transform_1, window_bounds = array<i64: 36, 8>}, {pipeline_mode = #tpu.pipeline_mode<synchronous>, transform_indices = @transform_2, window_bounds = array<i64: 1, 8>}, {pipeline_mode = #tpu.pipeline_mode<synchronous>, transform_indices = @transform_3, window_bounds = array<i64: 72, 8>}, {pipeline_mode = #tpu.pipeline_mode<synchronous>, transform_indices = @transform_4, window_bounds = array<i64: 1, 8>}, {transform_indices = @transform_5, window_bounds = array<i64: 1, 64, 8>}]} {
    %c0 = arith.constant 0 : index
    %c0_0 = arith.constant 0 : index
    %c0_1 = arith.constant 0 : index
    %c0_2 = arith.constant 0 : index
    %c0_3 = arith.constant 0 : index
    %0 = vector.load %arg1[%c0, %c0_0, %c0_1, %c0_2, %c0_3] : memref<1x8x2x8x8xbf16, #tpu.memory_space<vmem>>, vector<1x8x1x8x8xbf16>
    %1 = vector.shape_cast %0 : vector<1x8x1x8x8xbf16> to vector<8x8x8xbf16>
    %c0_4 = arith.constant 0 : index
    %c0_5 = arith.constant 0 : index
    %c1 = arith.constant 1 : index
    %c0_6 = arith.constant 0 : index
    %c0_7 = arith.constant 0 : index
    %2 = vector.load %arg1[%c0_4, %c0_5, %c1, %c0_6, %c0_7] : memref<1x8x2x8x8xbf16, #tpu.memory_space<vmem>>, vector<1x8x1x8x8xbf16>
    %3 = vector.shape_cast %2 : vector<1x8x1x8x8xbf16> to vector<8x8x8xbf16>
    %4 = arith.maximumf %1, %3 : vector<8x8x8xbf16>
    %5 = vector.extract_strided_slice %4 {offsets = [0, 0, 0], sizes = [8, 8, 4], strides = [1, 1, 1]} : vector<8x8x8xbf16> to vector<8x8x4xbf16>
    %6 = vector.extract_strided_slice %4 {offsets = [0, 0, 4], sizes = [8, 8, 4], strides = [1, 1, 1]} : vector<8x8x8xbf16> to vector<8x8x4xbf16>
    %7 = arith.maximumf %5, %6 : vector<8x8x4xbf16>
    %cst = arith.constant 0.000000e+00 : bf16
    %8 = vector.broadcast %cst : bf16 to vector<1x10x4xbf16>
    %c0_8 = arith.constant 0 : index
    %c0_9 = arith.constant 0 : index
    %c0_10 = arith.constant 0 : index
    %9 = vector.load %arg7[%c0_8, %c0_9, %c0_10] : memref<10x10x4xbf16, #tpu.memory_space<vmem>>, vector<1x10x4xbf16>
    tpu.vector_store %arg7[%c0_8, %c0_9, %c0_10], %8 {strides = array<i32>} : memref<10x10x4xbf16, #tpu.memory_space<vmem>>, vector<1x10x4xbf16>,
    %c9 = arith.constant 9 : index
    %c0_11 = arith.constant 0 : index
    %c0_12 = arith.constant 0 : index
    %10 = vector.load %arg7[%c9, %c0_11, %c0_12] : memref<10x10x4xbf16, #tpu.memory_space<vmem>>, vector<1x10x4xbf16>
    tpu.vector_store %arg7[%c9, %c0_11, %c0_12], %8 {strides = array<i32>} : memref<10x10x4xbf16, #tpu.memory_space<vmem>>, vector<1x10x4xbf16>,
    %cst_13 = arith.constant 0.000000e+00 : bf16
    %11 = vector.broadcast %cst_13 : bf16 to vector<10x1x4xbf16>
    %c0_14 = arith.constant 0 : index
    %c0_15 = arith.constant 0 : index
    %c0_16 = arith.constant 0 : index
    %12 = vector.load %arg7[%c0_14, %c0_15, %c0_16] : memref<10x10x4xbf16, #tpu.memory_space<vmem>>, vector<10x1x4xbf16>
    tpu.vector_store %arg7[%c0_14, %c0_15, %c0_16], %11 {strides = array<i32>} : memref<10x10x4xbf16, #tpu.memory_space<vmem>>, vector<10x1x4xbf16>,
    %c0_17 = arith.constant 0 : index
    %c9_18 = arith.constant 9 : index
    %c0_19 = arith.constant 0 : index
    %13 = vector.load %arg7[%c0_17, %c9_18, %c0_19] : memref<10x10x4xbf16, #tpu.memory_space<vmem>>, vector<10x1x4xbf16>
    tpu.vector_store %arg7[%c0_17, %c9_18, %c0_19], %11 {strides = array<i32>} : memref<10x10x4xbf16, #tpu.memory_space<vmem>>, vector<10x1x4xbf16>,
    %c1_20 = arith.constant 1 : index
    %c1_21 = arith.constant 1 : index
    %c0_22 = arith.constant 0 : index
    %14 = vector.load %arg7[%c1_20, %c1_21, %c0_22] : memref<10x10x4xbf16, #tpu.memory_space<vmem>>, vector<8x8x4xbf16>
    tpu.vector_store %arg7[%c1_20, %c1_21, %c0_22], %7 {strides = array<i32>} : memref<10x10x4xbf16, #tpu.memory_space<vmem>>, vector<8x8x4xbf16>,
    %c0_23 = arith.constant 0 : index
    %c0_24 = arith.constant 0 : index
    %15 = vector.load %arg3[%c0_23, %c0_24] : memref<1x8xf32, #tpu.memory_space<vmem>>, vector<1x8xf32>
    %c0_25 = arith.constant 0 : index
    %c0_26 = arith.constant 0 : index
    %c0_27 = arith.constant 0 : index
    %16 = vector.load %arg7[%c0_25, %c0_26, %c0_27] : memref<10x10x4xbf16, #tpu.memory_space<vmem>>, vector<8x10x4xbf16>
    %17 = vector.extract_strided_slice %16 {offsets = [0, 0, 0], sizes = [8, 8, 4], strides = [1, 1, 1]} : vector<8x10x4xbf16> to vector<8x8x4xbf16>
    %18 = vector.shape_cast %17 : vector<8x8x4xbf16> to vector<64x4xbf16>
    %19 = vector.extract_strided_slice %16 {offsets = [0, 1, 0], sizes = [8, 8, 4], strides = [1, 1, 1]} : vector<8x10x4xbf16> to vector<8x8x4xbf16>
    %20 = vector.shape_cast %19 : vector<8x8x4xbf16> to vector<64x4xbf16>
    %21 = vector.extract_strided_slice %16 {offsets = [0, 2, 0], sizes = [8, 8, 4], strides = [1, 1, 1]} : vector<8x10x4xbf16> to vector<8x8x4xbf16>
    %22 = vector.shape_cast %21 : vector<8x8x4xbf16> to vector<64x4xbf16>
    %23 = tpu.concatenate %18, %20, %22 in 1 : vector<64x4xbf16>, vector<64x4xbf16>, vector<64x4xbf16> -> vector<64x12xbf16>
    %c0_28 = arith.constant 0 : index
    %c0_29 = arith.constant 0 : index
    %24 = vector.load %arg2[%c0_28, %c0_29] : memref<36x8xbf16, #tpu.memory_space<vmem>>, vector<12x8xbf16>
    %cst_30 = arith.constant dense<0.000000e+00> : vector<64x8xf32>
    %25 = tpu.matmul %23, %24, %cst_30 {dimension_numbers = #tpu.dot_dimension_numbers<[1], [0], [0], [1], [0, 0, 1, 1], [], []>} : vector<64x12xbf16>, vector<12x8xbf16>, vector<64x8xf32> -> vector<64x8xf32>
    %c1_31 = arith.constant 1 : index
    %c0_32 = arith.constant 0 : index
    %c0_33 = arith.constant 0 : index
    %26 = vector.load %arg7[%c1_31, %c0_32, %c0_33] : memref<10x10x4xbf16, #tpu.memory_space<vmem>>, vector<8x10x4xbf16>
    %27 = vector.extract_strided_slice %26 {offsets = [0, 0, 0], sizes = [8, 8, 4], strides = [1, 1, 1]} : vector<8x10x4xbf16> to vector<8x8x4xbf16>
    %28 = vector.shape_cast %27 : vector<8x8x4xbf16> to vector<64x4xbf16>
    %29 = vector.extract_strided_slice %26 {offsets = [0, 1, 0], sizes = [8, 8, 4], strides = [1, 1, 1]} : vector<8x10x4xbf16> to vector<8x8x4xbf16>
    %30 = vector.shape_cast %29 : vector<8x8x4xbf16> to vector<64x4xbf16>
    %31 = vector.extract_strided_slice %26 {offsets = [0, 2, 0], sizes = [8, 8, 4], strides = [1, 1, 1]} : vector<8x10x4xbf16> to vector<8x8x4xbf16>
    %32 = vector.shape_cast %31 : vector<8x8x4xbf16> to vector<64x4xbf16>
    %33 = tpu.concatenate %28, %30, %32 in 1 : vector<64x4xbf16>, vector<64x4xbf16>, vector<64x4xbf16> -> vector<64x12xbf16>
    %c12 = arith.constant 12 : index
    %c0_34 = arith.constant 0 : index
    %34 = vector.load %arg2[%c12, %c0_34] : memref<36x8xbf16, #tpu.memory_space<vmem>>, vector<12x8xbf16>
    %cst_35 = arith.constant dense<0.000000e+00> : vector<64x8xf32>
    %35 = tpu.matmul %33, %34, %cst_35 {dimension_numbers = #tpu.dot_dimension_numbers<[1], [0], [0], [1], [0, 0, 1, 1], [], []>} : vector<64x12xbf16>, vector<12x8xbf16>, vector<64x8xf32> -> vector<64x8xf32>
    %36 = arith.addf %25, %35 : vector<64x8xf32>
    %c2 = arith.constant 2 : index
    %c0_36 = arith.constant 0 : index
    %c0_37 = arith.constant 0 : index
    %37 = vector.load %arg7[%c2, %c0_36, %c0_37] : memref<10x10x4xbf16, #tpu.memory_space<vmem>>, vector<8x10x4xbf16>
    %38 = vector.extract_strided_slice %37 {offsets = [0, 0, 0], sizes = [8, 8, 4], strides = [1, 1, 1]} : vector<8x10x4xbf16> to vector<8x8x4xbf16>
    %39 = vector.shape_cast %38 : vector<8x8x4xbf16> to vector<64x4xbf16>
    %40 = vector.extract_strided_slice %37 {offsets = [0, 1, 0], sizes = [8, 8, 4], strides = [1, 1, 1]} : vector<8x10x4xbf16> to vector<8x8x4xbf16>
    %41 = vector.shape_cast %40 : vector<8x8x4xbf16> to vector<64x4xbf16>
    %42 = vector.extract_strided_slice %37 {offsets = [0, 2, 0], sizes = [8, 8, 4], strides = [1, 1, 1]} : vector<8x10x4xbf16> to vector<8x8x4xbf16>
    %43 = vector.shape_cast %42 : vector<8x8x4xbf16> to vector<64x4xbf16>
    %44 = tpu.concatenate %39, %41, %43 in 1 : vector<64x4xbf16>, vector<64x4xbf16>, vector<64x4xbf16> -> vector<64x12xbf16>
    %c24 = arith.constant 24 : index
    %c0_38 = arith.constant 0 : index
    %45 = vector.load %arg2[%c24, %c0_38] : memref<36x8xbf16, #tpu.memory_space<vmem>>, vector<12x8xbf16>
    %cst_39 = arith.constant dense<0.000000e+00> : vector<64x8xf32>
    %46 = tpu.matmul %44, %45, %cst_39 {dimension_numbers = #tpu.dot_dimension_numbers<[1], [0], [0], [1], [0, 0, 1, 1], [], []>} : vector<64x12xbf16>, vector<12x8xbf16>, vector<64x8xf32> -> vector<64x8xf32>
    %47 = arith.addf %36, %46 : vector<64x8xf32>
    %48 = vector.broadcast %15 : vector<1x8xf32> to vector<64x8xf32>
    %49 = arith.addf %47, %48 : vector<64x8xf32>
    %cst_40 = arith.constant 0.000000e+00 : f32
    %50 = vector.broadcast %cst_40 : f32 to vector<64x8xf32>
    %51 = arith.maximumf %49, %50 : vector<64x8xf32>
    %cst_41 = arith.constant 0.000000e+00 : bf16
    %52 = vector.broadcast %cst_41 : bf16 to vector<1x10x8xbf16>
    %c0_42 = arith.constant 0 : index
    %c0_43 = arith.constant 0 : index
    %c0_44 = arith.constant 0 : index
    %53 = vector.load %arg8[%c0_42, %c0_43, %c0_44] : memref<10x10x8xbf16, #tpu.memory_space<vmem>>, vector<1x10x8xbf16>
    tpu.vector_store %arg8[%c0_42, %c0_43, %c0_44], %52 {strides = array<i32>} : memref<10x10x8xbf16, #tpu.memory_space<vmem>>, vector<1x10x8xbf16>,
    %c9_45 = arith.constant 9 : index
    %c0_46 = arith.constant 0 : index
    %c0_47 = arith.constant 0 : index
    %54 = vector.load %arg8[%c9_45, %c0_46, %c0_47] : memref<10x10x8xbf16, #tpu.memory_space<vmem>>, vector<1x10x8xbf16>
    tpu.vector_store %arg8[%c9_45, %c0_46, %c0_47], %52 {strides = array<i32>} : memref<10x10x8xbf16, #tpu.memory_space<vmem>>, vector<1x10x8xbf16>,
    %cst_48 = arith.constant 0.000000e+00 : bf16
    %55 = vector.broadcast %cst_48 : bf16 to vector<10x1x8xbf16>
    %c0_49 = arith.constant 0 : index
    %c0_50 = arith.constant 0 : index
    %c0_51 = arith.constant 0 : index
    %56 = vector.load %arg8[%c0_49, %c0_50, %c0_51] : memref<10x10x8xbf16, #tpu.memory_space<vmem>>, vector<10x1x8xbf16>
    tpu.vector_store %arg8[%c0_49, %c0_50, %c0_51], %55 {strides = array<i32>} : memref<10x10x8xbf16, #tpu.memory_space<vmem>>, vector<10x1x8xbf16>,
    %c0_52 = arith.constant 0 : index
    %c9_53 = arith.constant 9 : index
    %c0_54 = arith.constant 0 : index
    %57 = vector.load %arg8[%c0_52, %c9_53, %c0_54] : memref<10x10x8xbf16, #tpu.memory_space<vmem>>, vector<10x1x8xbf16>
    tpu.vector_store %arg8[%c0_52, %c9_53, %c0_54], %55 {strides = array<i32>} : memref<10x10x8xbf16, #tpu.memory_space<vmem>>, vector<10x1x8xbf16>,
    %58 = vector.shape_cast %51 : vector<64x8xf32> to vector<8x8x8xf32>
    %59 = arith.truncf %58 : vector<8x8x8xf32> to vector<8x8x8xbf16>
    %c1_55 = arith.constant 1 : index
    %c1_56 = arith.constant 1 : index
    %c0_57 = arith.constant 0 : index
    %60 = vector.load %arg8[%c1_55, %c1_56, %c0_57] : memref<10x10x8xbf16, #tpu.memory_space<vmem>>, vector<8x8x8xbf16>
    tpu.vector_store %arg8[%c1_55, %c1_56, %c0_57], %59 {strides = array<i32>} : memref<10x10x8xbf16, #tpu.memory_space<vmem>>, vector<8x8x8xbf16>,
    %c0_58 = arith.constant 0 : index
    %c0_59 = arith.constant 0 : index
    %61 = vector.load %arg5[%c0_58, %c0_59] : memref<1x8xf32, #tpu.memory_space<vmem>>, vector<1x8xf32>
    %c0_60 = arith.constant 0 : index
    %c0_61 = arith.constant 0 : index
    %c0_62 = arith.constant 0 : index
    %62 = vector.load %arg8[%c0_60, %c0_61, %c0_62] : memref<10x10x8xbf16, #tpu.memory_space<vmem>>, vector<8x10x8xbf16>
    %63 = vector.extract_strided_slice %62 {offsets = [0, 0, 0], sizes = [8, 8, 8], strides = [1, 1, 1]} : vector<8x10x8xbf16> to vector<8x8x8xbf16>
    %64 = vector.shape_cast %63 : vector<8x8x8xbf16> to vector<64x8xbf16>
    %65 = vector.extract_strided_slice %62 {offsets = [0, 1, 0], sizes = [8, 8, 8], strides = [1, 1, 1]} : vector<8x10x8xbf16> to vector<8x8x8xbf16>
    %66 = vector.shape_cast %65 : vector<8x8x8xbf16> to vector<64x8xbf16>
    %67 = vector.extract_strided_slice %62 {offsets = [0, 2, 0], sizes = [8, 8, 8], strides = [1, 1, 1]} : vector<8x10x8xbf16> to vector<8x8x8xbf16>
    %68 = vector.shape_cast %67 : vector<8x8x8xbf16> to vector<64x8xbf16>
    %69 = tpu.concatenate %64, %66, %68 in 1 : vector<64x8xbf16>, vector<64x8xbf16>, vector<64x8xbf16> -> vector<64x24xbf16>
    %c0_63 = arith.constant 0 : index
    %c0_64 = arith.constant 0 : index
    %70 = vector.load %arg4[%c0_63, %c0_64] : memref<72x8xbf16, #tpu.memory_space<vmem>>, vector<24x8xbf16>
    %cst_65 = arith.constant dense<0.000000e+00> : vector<64x8xf32>
    %71 = tpu.matmul %69, %70, %cst_65 {dimension_numbers = #tpu.dot_dimension_numbers<[1], [0], [0], [1], [0, 0, 1, 1], [], []>} : vector<64x24xbf16>, vector<24x8xbf16>, vector<64x8xf32> -> vector<64x8xf32>
    %c1_66 = arith.constant 1 : index
    %c0_67 = arith.constant 0 : index
    %c0_68 = arith.constant 0 : index
    %72 = vector.load %arg8[%c1_66, %c0_67, %c0_68] : memref<10x10x8xbf16, #tpu.memory_space<vmem>>, vector<8x10x8xbf16>
    %73 = vector.extract_strided_slice %72 {offsets = [0, 0, 0], sizes = [8, 8, 8], strides = [1, 1, 1]} : vector<8x10x8xbf16> to vector<8x8x8xbf16>
    %74 = vector.shape_cast %73 : vector<8x8x8xbf16> to vector<64x8xbf16>
    %75 = vector.extract_strided_slice %72 {offsets = [0, 1, 0], sizes = [8, 8, 8], strides = [1, 1, 1]} : vector<8x10x8xbf16> to vector<8x8x8xbf16>
    %76 = vector.shape_cast %75 : vector<8x8x8xbf16> to vector<64x8xbf16>
    %77 = vector.extract_strided_slice %72 {offsets = [0, 2, 0], sizes = [8, 8, 8], strides = [1, 1, 1]} : vector<8x10x8xbf16> to vector<8x8x8xbf16>
    %78 = vector.shape_cast %77 : vector<8x8x8xbf16> to vector<64x8xbf16>
    %79 = tpu.concatenate %74, %76, %78 in 1 : vector<64x8xbf16>, vector<64x8xbf16>, vector<64x8xbf16> -> vector<64x24xbf16>
    %c24_69 = arith.constant 24 : index
    %c0_70 = arith.constant 0 : index
    %80 = vector.load %arg4[%c24_69, %c0_70] : memref<72x8xbf16, #tpu.memory_space<vmem>>, vector<24x8xbf16>
    %cst_71 = arith.constant dense<0.000000e+00> : vector<64x8xf32>
    %81 = tpu.matmul %79, %80, %cst_71 {dimension_numbers = #tpu.dot_dimension_numbers<[1], [0], [0], [1], [0, 0, 1, 1], [], []>} : vector<64x24xbf16>, vector<24x8xbf16>, vector<64x8xf32> -> vector<64x8xf32>
    %82 = arith.addf %71, %81 : vector<64x8xf32>
    %c2_72 = arith.constant 2 : index
    %c0_73 = arith.constant 0 : index
    %c0_74 = arith.constant 0 : index
    %83 = vector.load %arg8[%c2_72, %c0_73, %c0_74] : memref<10x10x8xbf16, #tpu.memory_space<vmem>>, vector<8x10x8xbf16>
    %84 = vector.extract_strided_slice %83 {offsets = [0, 0, 0], sizes = [8, 8, 8], strides = [1, 1, 1]} : vector<8x10x8xbf16> to vector<8x8x8xbf16>
    %85 = vector.shape_cast %84 : vector<8x8x8xbf16> to vector<64x8xbf16>
    %86 = vector.extract_strided_slice %83 {offsets = [0, 1, 0], sizes = [8, 8, 8], strides = [1, 1, 1]} : vector<8x10x8xbf16> to vector<8x8x8xbf16>
    %87 = vector.shape_cast %86 : vector<8x8x8xbf16> to vector<64x8xbf16>
    %88 = vector.extract_strided_slice %83 {offsets = [0, 2, 0], sizes = [8, 8, 8], strides = [1, 1, 1]} : vector<8x10x8xbf16> to vector<8x8x8xbf16>
    %89 = vector.shape_cast %88 : vector<8x8x8xbf16> to vector<64x8xbf16>
    %90 = tpu.concatenate %85, %87, %89 in 1 : vector<64x8xbf16>, vector<64x8xbf16>, vector<64x8xbf16> -> vector<64x24xbf16>
    %c48 = arith.constant 48 : index
    %c0_75 = arith.constant 0 : index
    %91 = vector.load %arg4[%c48, %c0_75] : memref<72x8xbf16, #tpu.memory_space<vmem>>, vector<24x8xbf16>
    %cst_76 = arith.constant dense<0.000000e+00> : vector<64x8xf32>
    %92 = tpu.matmul %90, %91, %cst_76 {dimension_numbers = #tpu.dot_dimension_numbers<[1], [0], [0], [1], [0, 0, 1, 1], [], []>} : vector<64x24xbf16>, vector<24x8xbf16>, vector<64x8xf32> -> vector<64x8xf32>
    %93 = arith.addf %82, %92 : vector<64x8xf32>
    %94 = vector.broadcast %61 : vector<1x8xf32> to vector<64x8xf32>
    %95 = arith.addf %93, %94 : vector<64x8xf32>
    %cst_77 = arith.constant dense<0.000000e+00> : vector<8xf32>
    %96 = vector.multi_reduction <add>, %95, %cst_77 [0] : vector<64x8xf32> to vector<8xf32>
    %97 = vector.shape_cast %96 : vector<8xf32> to vector<1x8xf32>
    %cst_78 = arith.constant 1.562500e-02 : f32
    %98 = vector.broadcast %cst_78 : f32 to vector<1x8xf32>
    %99 = arith.mulf %97, %98 : vector<1x8xf32>
    %100 = arith.mulf %95, %95 : vector<64x8xf32>
    %cst_79 = arith.constant dense<0.000000e+00> : vector<8xf32>
    %101 = vector.multi_reduction <add>, %100, %cst_79 [0] : vector<64x8xf32> to vector<8xf32>
    %102 = vector.shape_cast %101 : vector<8xf32> to vector<1x8xf32>
    %cst_80 = arith.constant 1.562500e-02 : f32
    %103 = vector.broadcast %cst_80 : f32 to vector<1x8xf32>
    %104 = arith.mulf %102, %103 : vector<1x8xf32>
    %105 = arith.mulf %99, %99 : vector<1x8xf32>
    %106 = arith.subf %104, %105 : vector<1x8xf32>
    %cst_81 = arith.constant 0.000000e+00 : f32
    %107 = vector.broadcast %cst_81 : f32 to vector<1x8xf32>
    %108 = arith.maximumf %106, %107 : vector<1x8xf32>
    %109 = vector.broadcast %99 : vector<1x8xf32> to vector<64x8xf32>
    %110 = arith.subf %95, %109 : vector<64x8xf32>
    %cst_82 = arith.constant 9.99999974E-6 : f32
    %111 = vector.broadcast %cst_82 : f32 to vector<1x8xf32>
    %112 = arith.addf %108, %111 : vector<1x8xf32>
    %113 = math.rsqrt %112 : vector<1x8xf32>
    %114 = vector.broadcast %113 : vector<1x8xf32> to vector<64x8xf32>
    %115 = arith.mulf %110, %114 : vector<64x8xf32>
    %cst_83 = arith.constant 0.000000e+00 : f32
    %116 = vector.broadcast %cst_83 : f32 to vector<64x8xf32>
    %117 = arith.maximumf %115, %116 : vector<64x8xf32>
    %c0_84 = arith.constant 0 : index
    %c0_85 = arith.constant 0 : index
    %c0_86 = arith.constant 0 : index
    %118 = vector.load %arg6[%c0_84, %c0_85, %c0_86] : memref<1x64x8xf32, #tpu.memory_space<vmem>>, vector<1x64x8xf32>
    %119 = vector.shape_cast %118 : vector<1x64x8xf32> to vector<64x8xf32>
    %120 = vector.shape_cast %117 : vector<64x8xf32> to vector<1x64x8xf32>
    tpu.vector_store %arg6[%c0_84, %c0_85, %c0_86], %120 {strides = array<i32>} : memref<1x64x8xf32, #tpu.memory_space<vmem>>, vector<1x64x8xf32>,
    return
  }
  func.func @transform_0(%arg0: i32) -> (i32, i32, i32, i32, i32) {
    %c0_i32 = arith.constant 0 : i32
    %c0_i32_0 = arith.constant 0 : i32
    %c0_i32_1 = arith.constant 0 : i32
    %c0_i32_2 = arith.constant 0 : i32
    %c0_i32_3 = arith.constant 0 : i32
    return %arg0, %c0_i32, %c0_i32_0, %c0_i32_1, %c0_i32_2 : i32, i32, i32, i32, i32
  }
  func.func @transform_1(%arg0: i32) -> (i32, i32) {
    %c0_i32 = arith.constant 0 : i32
    %c0_i32_0 = arith.constant 0 : i32
    %c0_i32_1 = arith.constant 0 : i32
    return %c0_i32, %c0_i32_0 : i32, i32
  }
  func.func @transform_2(%arg0: i32) -> (i32, i32) {
    %c0_i32 = arith.constant 0 : i32
    %c0_i32_0 = arith.constant 0 : i32
    %c0_i32_1 = arith.constant 0 : i32
    return %c0_i32, %c0_i32_0 : i32, i32
  }
  func.func @transform_3(%arg0: i32) -> (i32, i32) {
    %c0_i32 = arith.constant 0 : i32
    %c0_i32_0 = arith.constant 0 : i32
    %c0_i32_1 = arith.constant 0 : i32
    return %c0_i32, %c0_i32_0 : i32, i32
  }
  func.func @transform_4(%arg0: i32) -> (i32, i32) {
    %c0_i32 = arith.constant 0 : i32
    %c0_i32_0 = arith.constant 0 : i32
    %c0_i32_1 = arith.constant 0 : i32
    return %c0_i32, %c0_i32_0 : i32, i32
  }
  func.func @transform_5(%arg0: i32) -> (i32, i32, i32) {
    %c0_i32 = arith.constant 0 : i32
    %c0_i32_0 = arith.constant 0 : i32
    %c0_i32_1 = arith.constant 0 : i32
    return %arg0, %c0_i32, %c0_i32_0 : i32, i32, i32
  }
}

</mosaic_0001>

<bundles_post_ra>
// kernel: downsample_block_fwd.1
= control target key start
LH: loop header
LB: loop body
LE: loop exit
PB: predicated region body
PF: predicated region fallthrough
CT: control target
= control target key end

     0   :  { %10 = vsyncpa [#allocation5], 0  ;;  %s5194_s0 = inlined_call_operand.hbm [shape: bf16[2,8,2,8,8], index: 0, kind: input, shape index: {}]   ;;  %s5195_s1 = inlined_call_operand.hbm [shape: bf16[36,8], index: 1, kind: input, shape index: {}]   ;;  %s5196_s2 = inlined_call_operand.hbm [shape: f32[1,8], index: 2, kind: input, shape index: {}]   ;;  %s5197_s3 = inlined_call_operand.hbm [shape: bf16[72,8], index: 3, kind: input, shape index: {}]   ;;  %s5198_s4 = inlined_call_operand.hbm [shape: f32[1,8], index: 4, kind: input, shape index: {}]   ;;  %s5199_s5 = inlined_call_operand.hbm [shape: f32[2,64,8], index: 5, kind: output, shape index: {}]  }
   0x1   :  { %12 = vsyncpa [#allocation5 + $0x1], 0 }
   0x2   :  { %13 = vsyncpa [#allocation8], 0 }
   0x3   :  { %14 = vsyncpa [#allocation11], 0 }
   0x4   :  { %15 = vsyncpa [#allocation6], 0 }
   0x5   :  { %17 = vsyncpa [#allocation6 + $0x1], 0  ;;  %s3820_s18 = smov 0   ;;  %s3822_s19 = smov 0  }
   0x6   :  { %s3824_s20 = smov 0   ;;  %s3826_s21 = smov 0  }
   0x7 LB: > { %s3841_s22 = sadd.s32 4294967295, %s3774_s21   ;;  %s3084_s23 = sadd.s32 4294967294, %s3774_s21   ;;  %s3774_s21 = sphi %s3826_s21, %s5238_s21   ;;  %s3770_s20 = sphi %s3824_s20, %s5237_s20   ;;  %s3766_s19 = sphi %s3822_s19, %s5236_s19   ;;  %s3762_s18 = sphi %s3820_s18, %s5235_s18  }
   0x8   : > { %p43_p0 = scmp.ne.s32.totalorder %s3766_s19, %s3762_s18  ;;  %p5200_p1 = scmp.eq.s32.totalorder %s3841_s22, 0 }
   0x9   : > { %p157_p3 = scmp.eq.s32.totalorder %s3084_s23, 1  ;;  %p3085_p5 = scmp.ge.s32.totalorder %s3774_s21, 1 }
   0xa   : > { %p3850_p4 = por %p5200_p1, %p43_p0  ;;  %p164_p7 = scmp.lt.s32.totalorder %s3774_s21, 3 }
   0xb   : > { %p3855_p6 = por %p157_p3, %p43_p0  ;;  %s3776_s27 = smov [#allocation7]  }
   0xc   : > { %s5203_s24 = scalar_select %p3850_p4, 1, 0 }
   0xd   : > { %s5204_s25 = scalar_select %p3855_p6, 1, 0 }
   0xe   : > { %p3860_p8 = pnand %p3085_p5, %p164_p7  ;;  %s176_s28 = sshll.u32 %s3776_s27, 4  ;;  %s3864_s28 = int_to_ptr.vmem [resolvable:$true] %s176_s28 }
   0xf   : > { %s3777_s30 = smov [#allocation10]   ;;  %s3778_s7 = smov [#allocation9]  }
  0x10   : > { %s5205_s26 = scalar_select %p3860_p8, 1, 0 }
  0x11   : > { %p3444_p9 = pneg %p3860_p8  ;;  %s200_s6 = sshll.u32 %s3777_s30, 4  ;;  %s3875_s6 = int_to_ptr.vmem [resolvable:$true] %s200_s6 }
  0x12   : > { %s3877_s8 = sshll.u32 %s3778_s7, 4  ;;  %s3558_s11 = scalar_lea.hbm %s5195_s1, 320  ;;  %s191_s8 = int_to_ptr.vmem [resolvable:$true] %s3877_s8 }
  0x13   : > { %p3871_p11 = pnand %p3444_p9, %p5200_p1  ;;  %p3559_p12 = scmp.ne.s32.totalorder %s5195_s1, %s3558_s11 }
  0x14   : > { %p3565_p5 = scmp.lt.u32.totalorder %s3558_s11, %s5195_s1 }
  0x15   : > { %p3887_p13 = pneg %p3871_p11 }
  0x17   : > { %p3561_p0 = pnand %p3887_p13, %p3559_p12 }
  0x19   : > { %p3562_p3 = pneg %p3561_p0 }
  0x1b   : > { %p3567_p7 = pnand %p3565_p5, %p3562_p3 }
  0x1d   : > { %3570 = shalt.err (!%p3567_p7)
}
  0x1e   : > { %s3571_s17 = scalar_lea.vmem %s3864_s28, 320  ;;  %p3579_p2 = scmp.lt.s32.totalorder %s3864_s28, %s3864_s28 }
  0x1f   : > { %p3572_p9 = scmp.ne.s32.totalorder %s3864_s28, %s3571_s17  ;;  %p3580_p6 = scmp.lt.s32.totalorder %s3571_s17, %s3571_s17 }
  0x21   : > { %p3574_p10 = pnand %p3572_p9, %p3887_p13  ;;  %p3581_p12 = por %p3580_p6, %p3579_p2 }
  0x23   : > { %p3575_p1 = pneg %p3574_p10 }
  0x25   : > { %p3582_p0 = pnand %p3581_p12, %p3575_p1 }
  0x27   : > { %3585 = shalt.err (!%p3582_p0)
}
  0x28   : > { %s3779_s23 = smov 64   ;;  %s3780_s27 = smov 4  }
  0x29   : > { %3447 = dma.hbm_to_vmem [thread:$0]  (!%p3871_p11), %s5195_s1, 320, %s3864_s28, [#allocation8], %s3779_s23, %s3779_s23, %s3780_s27  }
  0x2a   : > { %s3586_s11 = scalar_lea.hbm %s5197_s3, 576 }
  0x2b   : > { %p3587_p1 = scmp.ne.s32.totalorder %s5197_s3, %s3586_s11  ;;  %p3593_p10 = scmp.lt.u32.totalorder %s3586_s11, %s5197_s3 }
  0x2d   : > { %p3589_p2 = pnand %p3587_p1, %p3887_p13 }
  0x2f   : > { %p3590_p6 = pneg %p3589_p2 }
  0x31   : > { %p3595_p3 = pnand %p3593_p10, %p3590_p6 }
  0x33   : > { %3598 = shalt.err (!%p3595_p3)
}
  0x34   : > { %s3599_s28 = scalar_lea.vmem %s3875_s6, 576  ;;  %p3607_p12 = scmp.lt.s32.totalorder %s3875_s6, %s3875_s6 }
  0x35   : > { %p3600_p5 = scmp.ne.s32.totalorder %s3875_s6, %s3599_s28  ;;  %p3608_p0 = scmp.lt.s32.totalorder %s3599_s28, %s3599_s28 }
  0x37   : > { %p3602_p7 = pnand %p3600_p5, %p3887_p13  ;;  %p3609_p1 = por %p3608_p0, %p3607_p12 }
  0x39   : > { %p3603_p9 = pneg %p3602_p7 }
  0x3b   : > { %p3610_p2 = pnand %p3609_p1, %p3603_p9 }
  0x3d   : > { %3613 = shalt.err (!%p3610_p2)
}
  0x3e   : > { %3453 = dma.hbm_to_vmem [thread:$0]  (!%p3871_p11), %s5197_s3, 576, %s3875_s6, [#allocation11], %s3779_s23, %s3779_s23, %s3780_s27  }
  0x3f   : > { %s3614_s10 = scalar_lea.hbm %s5196_s2, 16 }
  0x40   : > { %p3615_p6 = scmp.ne.s32.totalorder %s5196_s2, %s3614_s10  ;;  %p3621_p5 = scmp.lt.u32.totalorder %s3614_s10, %s5196_s2 }
  0x42   : > { %p3617_p10 = pnand %p3615_p6, %p3887_p13 }
  0x44   : > { %p3618_p3 = pneg %p3617_p10 }
  0x46   : > { %p3623_p7 = pnand %p3621_p5, %p3618_p3 }
  0x48   : > { %3626 = shalt.err (!%p3623_p7)
}
  0x49   : > { %s3627_s16 = scalar_lea.vmem %s191_s8, 16  ;;  %s3634_s6 = scalar_lea.vmem %s191_s8, 32 }
  0x4a   : > { %p3628_p9 = scmp.ne.s32.totalorder %s191_s8, %s3627_s16  ;;  %p3635_p1 = scmp.lt.s32.totalorder %s191_s8, %s191_s8 }
  0x4b   : > { %p3636_p2 = scmp.lt.s32.totalorder %s3634_s6, %s3627_s16 }
  0x4c   : > { %p3630_p12 = pnand %p3628_p9, %p3887_p13 }
  0x4d   : > { %p3637_p4 = por %p3636_p2, %p3635_p1 }
  0x4e   : > { %p3631_p0 = pneg %p3630_p12 }
  0x50   : > { %p3638_p8 = pnand %p3637_p4, %p3631_p0 }
  0x52   : > { %3641 = shalt.err (!%p3638_p8)
}
  0x53   : > { %3450 = dma.hbm_to_vmem [thread:$0]  (!%p3871_p11), %s5196_s2, 16, %s191_s8, [#allocation8]  }
  0x54   : > { %s3781_s30 = smov [#allocation12]   ;;  %s3642_s11 = scalar_lea.hbm %s5198_s4, 16 }
  0x55   : > { %s214_s7 = sshll.u32 %s3781_s30, 4  ;;  %p3643_p6 = scmp.ne.s32.totalorder %s5198_s4, %s3642_s11  ;;  %s215_s7 = int_to_ptr.vmem [resolvable:$true] %s214_s7 }
  0x56   : > { %p3649_p10 = scmp.lt.u32.totalorder %s3642_s11, %s5198_s4 }
  0x57   : > { %p3645_p4 = pnand %p3643_p6, %p3887_p13 }
  0x59   : > { %p3646_p8 = pneg %p3645_p4 }
  0x5b   : > { %p3651_p3 = pnand %p3649_p10, %p3646_p8 }
  0x5d   : > { %3654 = shalt.err (!%p3651_p3)
}
  0x5e   : > { %s3655_s8 = scalar_lea.vmem %s215_s7, 16  ;;  %s3662_s6 = scalar_lea.vmem %s215_s7, 32 }
  0x5f   : > { %p3656_p5 = scmp.ne.s32.totalorder %s215_s7, %s3655_s8  ;;  %p3663_p12 = scmp.lt.s32.totalorder %s215_s7, %s215_s7 }
  0x60   : > { %p3664_p0 = scmp.lt.s32.totalorder %s3662_s6, %s3655_s8 }
  0x61   : > { %p3658_p7 = pnand %p3656_p5, %p3887_p13 }
  0x62   : > { %p3665_p1 = por %p3664_p0, %p3663_p12 }
  0x63   : > { %p3659_p9 = pneg %p3658_p7 }
  0x65   : > { %p3666_p2 = pnand %p3665_p1, %p3659_p9 }
  0x67   : > { %3669 = shalt.err (!%p3666_p2)
}
  0x68   : > { %3456 = dma.hbm_to_vmem [thread:$0]  (!%p3871_p11), %s5198_s4, 16, %s215_s7, [#allocation11]  }
  0x69   : > { %s3975_s14 = sadd.s32 1, %s3774_s21   ;;  %s30_s30 = sadd.s32 1, %s3770_s20 }
  0x6a   : > { %s27_s29 = ssub.s32 %s3774_s21, %s3975_s14  ;;  %p37_p13 = scmp.ne.s32.totalorder %s3770_s20, %s3766_s19 }
  0x6b   : > { %p28_p6 = scmp.eq.s32.totalorder %s27_s29, 0  ;;  %p38_p4 = scmp.eq.s32.totalorder %s3774_s21, 0 }
  0x6c   : > { %p5208_p8 = scmp.eq.s32.totalorder %s3841_s22, 1  ;;  %p3469_p3 = scmp.lt.s32.totalorder %s3774_s21, 2 }
  0x6d   : > { %s3991_s10 = scalar_select %p28_p6, %s3770_s20, %s30_s30  }
  0x6e   : > { %p3985_p10 = por %p5208_p8, %p37_p13  ;;  %p39_p5 = por %p38_p4, %p37_p13 }
  0x6f   : > { %s225_s11 = sand.u32 1, %s3770_s20   ;;  %s3277_s7 = sshll.u32 %s3774_s21, 10 }
  0x70   : > { %s3091_s12 = sshll.u32 %s225_s11, 6  ;;  %s3998_s16 = scalar_lea.hbm %s5194_s0, %s3277_s7 }
  0x71   : > { %s229_s8 = scalar_lea.vmem [#allocation4], %s3091_s12  ;;  %p4002_p11 = pnand %p3469_p3, %p39_p5 }
  0x72   : > { %s236_s6 = sshll.u32 %s229_s8, 4  ;;  %s4006_s17 = scalar_lea.sflag [#allocation5], %s225_s11  ;;  %s4000_s6 = int_to_ptr.vmem [resolvable:$true] %s236_s6 }
  0x73   : > { %s3670_s30 = scalar_lea.hbm %s3998_s16, 1024  ;;  %p3672_p9 = pneg %p4002_p11 }
  0x74   : > { %p3671_p7 = scmp.ne.s32.totalorder %s3998_s16, %s3670_s30  ;;  %s3675_s7 = scalar_lea.hbm %s5194_s0, 2048 }
  0x75   : > { %p3676_p1 = scmp.lt.u32.totalorder %s3998_s16, %s5194_s0  ;;  %p3677_p2 = scmp.lt.u32.totalorder %s3675_s7, %s3670_s30 }
  0x76   : > { %p3673_p12 = pnand %p3672_p9, %p3671_p7  ;;  %p3679_p6 = scmp.lt.u32.totalorder %s3670_s30, %s3998_s16 }
  0x77   : > { %p3678_p13 = por %p3677_p2, %p3676_p1 }
  0x78   : > { %p3674_p0 = pneg %p3673_p12 }
  0x79   : > { %p3680_p4 = por %p3679_p6, %p3678_p13 }
  0x7b   : > { %p3681_p8 = pnand %p3680_p4, %p3674_p0 }
  0x7d   : > { %3684 = shalt.err (!%p3681_p8)
}
  0x7e   : > { %s3685_s11 = scalar_lea.vmem %s4000_s6, 1024  ;;  %s3782_s8 = smov [#allocation4]  }
  0x7f   : > { %p3686_p3 = scmp.ne.s32.totalorder %s4000_s6, %s3685_s11  ;;  %s3690_s29 = sshll.u32 %s3782_s8, 4  ;;  %s3691_s29 = int_to_ptr.vmem [resolvable:$false] %s3690_s29 }
  0x80   : > { %s3692_s12 = scalar_lea.vmem %s3691_s29, 2048  ;;  %p3693_p12 = scmp.lt.s32.totalorder %s4000_s6, %s3691_s29 }
  0x81   : > { %p3688_p5 = pnand %p3686_p3, %p3672_p9  ;;  %p3694_p1 = scmp.lt.s32.totalorder %s3692_s12, %s3685_s11 }
  0x83   : > { %p3689_p7 = pneg %p3688_p5  ;;  %p3695_p2 = por %p3694_p1, %p3693_p12 }
  0x85   : > { %p3696_p13 = pnand %p3695_p2, %p3689_p7 }
  0x87   : > { %3699 = shalt.err (!%p3696_p13)
}
  0x88   : > { %3460 = dma.hbm_to_vmem [thread:$0]  (!%p4002_p11), %s3998_s16, 1024, %s4000_s6, %s4006_s17, %s3779_s23, %s3779_s23, %s3780_s27  }
  0x89   : > { %p5211_p9 = scmp.ne.s32.totalorder %s5205_s26, 0 }
  0x8a   : > { %s4040_s30 = sand.u32 (!%p5211_p9), 1, %s3766_s19   ;;  %p5212_p0 = scmp.ne.s32.totalorder (!%p5211_p9), %s5203_s24, 0 }
  0x8b   : > { %248 = sbr.rel (%p5211_p9) target bundleno = 1196 (0x4ac), region = 40  ;;  %s3095_s7 = sshll.u32 (!%p5211_p9), %s4040_s30, 6 }
  0x8c   : > { %s251_s13 = scalar_lea.sflag (!%p5211_p9), [#allocation5], %s4040_s30  ;;  %s4046_s28 = scalar_lea.vmem (!%p5211_p9), [#allocation4], %s3095_s7 }
  0x92   : > { %3745 = dma.done.wait (%p5212_p0), %s251_s13, 1024  }
  0x93   : > { %3747 = vsyncadd (%p5212_p0), %s251_s13, 4294966272  ;;  %p5213_p11 = scmp.eq.s32.totalorder %s3841_s22, 0 }
  0x95   : > { %3749 = dma.done.wait (%p5213_p11), [#allocation8], 336   ;;  %p5214_p6 = pmov %p5213_p11 }
  0x97   : > { %3751 = vsyncadd (%p5214_p6), [#allocation8], 4294966960  ;;  %p5215_p4 = pmov %p5214_p6 }
  0x99   : > { %3753 = dma.done.wait (%p5215_p4), [#allocation11], 592   ;;  %p5216_p8 = pmov %p5215_p4 }
  0x9a   : > { %vm363_vm0 = vcmask 27648   ;;  %vm365_vm1 = vcmask 24576   ;;  %v3783_v0 = vmov 0   ;;  %vm1604_vm2 = vcmask 57344   ;;  %v300_v2 = vld [vmem:[%s4046_s28 + $0x10] sm:$0xf] }
  0x9b   : > { %3755 = vsyncadd (%p5216_p8), [#allocation11], 4294966704  ;;  %364 = vst.msk [vmem:[#allocation2] sm:$0xf] %vm363_vm0, %v3783_v0  ;;  %vm371_vm3 = vsmask.f32 256 }
  0x9c   : > { %366 = vst.msk [vmem:[#allocation2 + $0x4] sm:$0x1] %vm365_vm1, %v3783_v0  ;;  %369 = vst.msk [vmem:[#allocation2 + $0x4c] sm:$0x1] %vm365_vm1, %v3783_v0  ;;  %vm403_vm5 = vsmask.f32 7938 }
  0x9d   : > { %368 = vst.msk [vmem:[#allocation2 + $0x48] sm:$0xf] %vm363_vm0, %v3783_v0  ;;  %vm4073_vm4 = vmand %vm1604_vm2, %vm371_vm3  ;;  %v3103_v3 = vld [vmem:[%s4046_s28 + $0x14] sm:$0xf]  ;;  %v298_v4 = vld [vmem:[%s4046_s28] sm:$0xf] }
  0x9e   : > { %1605 = vst.msk [vmem:[#allocation3 + $0x4] sm:$0x1] %vm1604_vm2, %v3783_v0  ;;  %1608 = vst.msk [vmem:[#allocation3 + $0x4c] sm:$0x1] %vm1604_vm2, %v3783_v0  ;;  %v4080_v5 = vmax.bf16 %v3103_v3, %v300_v2  ;;  %v3101_v6 = vld [vmem:[%s4046_s28 + $0x4] sm:$0xf] }
  0x9f   : > { %v301_v7 = vld [vmem:[%s4046_s28 + $0x18] sm:$0xf]  ;;  %v3104_v8 = vld [vmem:[%s4046_s28 + $0x1c] sm:$0xf]  ;;  %v4085_v9 = vmax.bf16 %v3101_v6, %v298_v4  ;;  %v299_v10 = vld [vmem:[%s4046_s28 + $0x8] sm:$0xf] }
  0xa0   : > { %v3102_v11 = vld [vmem:[%s4046_s28 + $0xc] sm:$0xf]  ;;  %vm4090_vm6 = vmand %vm365_vm1, %vm371_vm3  ;;  %s3784_s24 = smov 124   ;;  %v4096_v13 = vmax.bf16 %v3104_v8, %v301_v7  ;;  %v303_v16 = vld [vmem:[%s4046_s28 + $0x28] sm:$0xf]  ;;  %vm714_vm10 = vcmask 1042432  }
  0xa1   : > { %335 = vrot.lane.b32.xlu1 %v4080_v5, %s3784_s24  ;;  %vm4100_vm7 = vmand %vm365_vm1, %vm403_vm5  ;;  %331 = vrot.lane.b32.xlu0 %v4085_v9, %s3784_s24  ;;  %v4106_v15 = vmax.bf16 %v3102_v11, %v299_v10  ;;  %v3106_v17 = vld [vmem:[%s4046_s28 + $0x2c] sm:$0xf]  ;;  %v302_v18 = vld [vmem:[%s4046_s28 + $0x20] sm:$0xf]  ;;  %vm583_vm8 = vsmask.f32 3328 }
  0xa2   : > { %v3105_v19 = vld [vmem:[%s4046_s28 + $0x24] sm:$0xf]  ;;  %v373_v20 = vld [vmem:[#allocation2] sm:$0x1]  ;;  %v382_v21 = vld [vmem:[#allocation2 + $0x18] sm:$0x1]  ;;  %v4120_v28 = vmax.bf16 %v3106_v17, %v303_v16 }
  0xa3   : > { %v305_v22 = vld [vmem:[%s4046_s28 + $0x38] sm:$0xf]  ;;  %v3108_v23 = vld [vmem:[%s4046_s28 + $0x3c] sm:$0xf]  ;;  %v374_v24 = vsel %vm4090_vm6, 0, %v373_v20  ;;  %v383_v25 = vsel %vm4090_vm6, 0, %v382_v21  ;;  %v4130_v35 = vmax.bf16 %v3105_v19, %v302_v18  ;;  %vm4211_vm14 = vmand %vm363_vm0, %vm403_vm5 }
  0xa4   : > { %v400_v26 = vld [vmem:[#allocation2 + $0x48] sm:$0x1]  ;;  %v414_v27 = vld [vmem:[#allocation2 + $0x1c] sm:$0x1]  ;;  %v304_v29 = vld [vmem:[%s4046_s28 + $0x30] sm:$0xf]  ;;  %v4146_v48 = vmax.bf16 %v3108_v23, %v305_v22 }
  0xa5   : > { %337 = vrot.lane.b32.xlu1 %v4096_v13, %s3784_s24  ;;  %v3107_v30 = vld [vmem:[%s4046_s28 + $0x34] sm:$0xf]  ;;  %375 = vst [vmem:[#allocation2] sm:$0x1] %v374_v24  ;;  %384 = vst [vmem:[#allocation2 + $0x18] sm:$0x1] %v383_v25  ;;  %333 = vrot.lane.b32.xlu0 %v4106_v15, %s3784_s24 }
  0xa6   : > { %v401_v31 = vsel %vm4090_vm6, 0, %v400_v26  ;;  %v415_v32 = vsel %vm4100_vm7, 0, %v414_v27  ;;  %v376_v33 = vld [vmem:[#allocation2 + $0x8] sm:$0x1]  ;;  %v408_v34 = vld [vmem:[#allocation2 + $0xc] sm:$0x1]  ;;  %v4154_v53 = vmax.bf16 %v3107_v30, %v304_v29 }
  0xa7   : > { %402 = vst [vmem:[#allocation2 + $0x48] sm:$0x1] %v401_v31  ;;  %416 = vst [vmem:[#allocation2 + $0x1c] sm:$0x1] %v415_v32  ;;  %v377_v36 = vsel %vm4090_vm6, 0, %v376_v33  ;;  %v409_v37 = vsel %vm4100_vm7, 0, %v408_v34 }
  0xa8   : > { %v385_v38 = vld [vmem:[#allocation2 + $0x20] sm:$0x1]  ;;  %v417_v39 = vld [vmem:[#allocation2 + $0x24] sm:$0x1]  ;;  %378 = vst [vmem:[#allocation2 + $0x8] sm:$0x1] %v377_v36 }
  0xa9   : > { %410 = vst [vmem:[#allocation2 + $0xc] sm:$0x1] %v409_v37  ;;  %v386_v40 = vsel %vm4090_vm6, 0, %v385_v38  ;;  %v418_v41 = vsel %vm4100_vm7, 0, %v417_v39  ;;  %v379_v42 = vld [vmem:[#allocation2 + $0x10] sm:$0x1]  ;;  %341 = vrot.lane.b32.xlu1 %v4120_v28, %s3784_s24  ;;  %339 = vrot.lane.b32.xlu0 %v4130_v35, %s3784_s24 }
  0xaa   : > { %v411_v43 = vld [vmem:[#allocation2 + $0x14] sm:$0x1]  ;;  %387 = vst [vmem:[#allocation2 + $0x20] sm:$0x1] %v386_v40  ;;  %419 = vst [vmem:[#allocation2 + $0x24] sm:$0x1] %v418_v41 }
  0xab   : > { %v380_v44 = vsel %vm4090_vm6, 0, %v379_v42  ;;  %v412_v45 = vsel %vm4100_vm7, 0, %v411_v43  ;;  %v391_v46 = vld [vmem:[#allocation2 + $0x30] sm:$0x1]  ;;  %v423_v47 = vld [vmem:[#allocation2 + $0x34] sm:$0x1] }
  0xac   : > { %381 = vst [vmem:[#allocation2 + $0x10] sm:$0x1] %v380_v44  ;;  %413 = vst [vmem:[#allocation2 + $0x14] sm:$0x1] %v412_v45  ;;  %v392_v49 = vsel %vm4090_vm6, 0, %v391_v46  ;;  %v424_v50 = vsel %vm4100_vm7, 0, %v423_v47 }
  0xad   : > { %v388_v51 = vld [vmem:[#allocation2 + $0x28] sm:$0x1]  ;;  %v420_v52 = vld [vmem:[#allocation2 + $0x2c] sm:$0x1]  ;;  %393 = vst [vmem:[#allocation2 + $0x30] sm:$0x1] %v392_v49  ;;  %345 = vrot.lane.b32.xlu1 %v4146_v48, %s3784_s24  ;;  %343 = vrot.lane.b32.xlu0 %v4154_v53, %s3784_s24 }
  0xae   : > { %425 = vst [vmem:[#allocation2 + $0x34] sm:$0x1] %v424_v50  ;;  %v389_v54 = vsel %vm4090_vm6, 0, %v388_v51  ;;  %v421_v55 = vsel %vm4100_vm7, 0, %v420_v52  ;;  %v397_v56 = vld [vmem:[#allocation2 + $0x40] sm:$0x1] }
  0xaf   : > { %v429_v57 = vld [vmem:[#allocation2 + $0x44] sm:$0x1]  ;;  %390 = vst [vmem:[#allocation2 + $0x28] sm:$0x1] %v389_v54  ;;  %422 = vst [vmem:[#allocation2 + $0x2c] sm:$0x1] %v421_v55 }
  0xb0   : > { %v398_v58 = vsel %vm4090_vm6, 0, %v397_v56  ;;  %v430_v59 = vsel %vm4100_vm7, 0, %v429_v57  ;;  %v394_v60 = vld [vmem:[#allocation2 + $0x38] sm:$0x1]  ;;  %v426_v61 = vld [vmem:[#allocation2 + $0x3c] sm:$0x1] }
  0xb1   : > { %399 = vst [vmem:[#allocation2 + $0x40] sm:$0x1] %v398_v58  ;;  %431 = vst [vmem:[#allocation2 + $0x44] sm:$0x1] %v430_v59  ;;  %v395_v62 = vsel %vm4090_vm6, 0, %v394_v60  ;;  %v427_v63 = vsel %vm4100_vm7, 0, %v426_v61 }
  0xb2   : > { %396 = vst [vmem:[#allocation2 + $0x38] sm:$0x1] %v395_v62  ;;  %428 = vst [vmem:[#allocation2 + $0x3c] sm:$0x1] %v427_v63  ;;  %v405_v2 = vld [vmem:[#allocation2 + $0x4] sm:$0x1] }
  0xb3   : > { %v406_v3 = vsel %vm4100_vm7, 0, %v405_v2  ;;  %v432_v4 = vld [vmem:[#allocation2 + $0x4c] sm:$0x1]  ;;  %v567_v7 = vld [vmem:[#allocation2] sm:$0xf]  ;;  %vm715_vm11 = vcmask 1046532  }
  0xb4   : > { %407 = vst [vmem:[#allocation2 + $0x4] sm:$0x1] %v406_v3  ;;  %v433_v6 = vsel %vm4100_vm7, 0, %v432_v4  ;;  %v587_v8 = vshrl.u32 %v567_v7, 16  ;;  %v590_v10 = vshll.u32 %v567_v7, 16  ;;  %v3109_v24 = vrot.slane %v567_v7, 9  ;;  %vm4187_vm13 = vmor %vm714_vm10, %vm715_vm11 }
  0xb5   : > { %434 = vst [vmem:[#allocation2 + $0x4c] sm:$0x1] %v433_v6  ;;  %vm584_vm9 = vsmask.f32 7440  ;;  %v4176_v20 = vld [vmem:[#allocation2 + $0x48] sm:$0xf] }
  0xb6   : > { %v589_v11 = vrot.slane %v587_v8, 4  ;;  %v592_v16 = vrot.slane %v590_v10, 5  ;;  %vm4178_vm12 = vmor %vm583_vm8, %vm584_vm9  ;;  %v1356_v30 = vshrl.u32 %v4176_v20, 16  ;;  %v1359_v33 = vshll.u32 %v4176_v20, 16  ;;  %v530_v37 = vld [vmem:[#allocation2 + $0x18] sm:$0xf] }
  0xb7   : > { %v533_v41 = vld [vmem:[#allocation2 + $0x1c] sm:$0x1]  ;;  %v518_v49 = vld [vmem:[#allocation2 + $0x8] sm:$0xf]  ;;  %v521_v56 = vld [vmem:[#allocation2 + $0xc] sm:$0x1] }
  0xb8   : > { %v593_v18 = vor.u32 %v592_v16, %v589_v11  ;;  %v4206_v45 = vrot.slane %v1356_v30, 4  ;;  %v4216_v54 = vrot.slane %v1359_v33, 5  ;;  %v536_v4 = vld [vmem:[#allocation2 + $0x20] sm:$0xf]  ;;  %v539_v11 = vld [vmem:[#allocation2 + $0x24] sm:$0x1] }
  0xb9   : > { %v524_v16 = vld [vmem:[#allocation2 + $0x10] sm:$0xf]  ;;  %s3785_s26 = smov 4   ;;  %s3786_s23 = smov 8   ;;  %vm1090_vm15 = vcmask 1045504   ;;  %vm801_vm0 = vcmask 31744  }
  0xba   : > { %v4182_v14 = vrot.slane %v593_v18, 4  ;;  %vm814_vm1 = vcmask 64512   ;;  %vm1081_vm3 = vcmask 97280   ;;  %vm1602_vm7 = vcmask 60416   ;;  %s3787_s27 = smov 16   ;;  %s3286_s16 = sshll.u32 %s3841_s22, 10 }
  0xbb   : > { %v568_v17 = vld [vmem:[#allocation2 + $0x4] sm:$0x1]  ;;  %1603 = vst.msk [vmem:[#allocation3] sm:$0xf] %vm1602_vm7, %v3783_v0  ;;  %1607 = vst.msk [vmem:[#allocation3 + $0x48] sm:$0xf] %vm1602_vm7, %v3783_v0  ;;  %s5139_s22 = scalar_lea.hbm %s5199_s5, %s3286_s16 }
  0xbc   : > { %v596_v19 = vshll.u32 %v568_v17, 16  ;;  %v719_v25 = vrot.slane %v568_v17, 5  ;;  %v4193_v32 = vld [vmem:[#allocation2 + $0x4c] sm:$0x1]  ;;  %v1645_v0 = vld [vmem:[#allocation3 + $0xc] sm:$0x1] }
  0xbd   : > { %v1415_v46 = vrot.slane %v4193_v32, 5  ;;  %vm2348_vm8 = vcmask 195584   ;;  %s296_s6 = scalar_lea.vmem [#allocation13], %s3095_s7  ;;  %s2960_s8 = scalar_lea.sflag [#allocation6], %s4040_s30 }
  0xbe   : > { %v4184_v23 = vrot.slane %v596_v19, 5  ;;  %v4202_v40 = vsel %vm4187_vm13, %v3109_v24, %v719_v25  ;;  %v527_v24 = vld [vmem:[#allocation2 + $0x14] sm:$0x1]  ;;  %s2973_s17 = sshll.u32 %s296_s6, 4  ;;  %s3788_s12 = smov [#allocation13]   ;;  %s5141_s17 = int_to_ptr.vmem [resolvable:$true] %s2973_s17 }
  0xbf   : > { %s3700_s29 = scalar_lea.vmem %s5141_s17, 1024  ;;  %s3704_s7 = sshll.u32 %s3788_s12, 4  ;;  %s3705_s7 = int_to_ptr.vmem [resolvable:$false] %s3704_s7 }
  0xc0   : > { %p3701_p3 = scmp.ne.s32.totalorder %s5141_s17, %s3700_s29  ;;  %s3706_s13 = scalar_lea.vmem %s3705_s7, 2048 }
  0xc1   : > { %p3707_p12 = scmp.lt.s32.totalorder %s5141_s17, %s3705_s7  ;;  %p3708_p1 = scmp.lt.s32.totalorder %s3706_s13, %s3700_s29 }
  0xc2   : > { %p3702_p5 = pnand %p3701_p3, %p3985_p10 }
  0xc3   : > { %p3709_p2 = por %p3708_p1, %p3707_p12 }
  0xc4   : > { %p3703_p7 = pneg %p3702_p5 }
  0xc6   : > { %p3710_p13 = pnand %p3709_p2, %p3703_p7 }
 0x113   : > { %v336_v21 = vpop.permute.xlu1 %335  ;;  %v332_v27 = vpop.permute.xlu0 %331 }
 0x114   : > { %v357_v26 = vmax.bf16 %v336_v21, %v4080_v5  ;;  %v355_v31 = vmax.bf16 %v332_v27, %v4085_v9  ;;  %v599_v5 = vsel %vm4178_vm12, %v4182_v14, %v4184_v23  ;;  %v3166_v9 = vrot.slane %v4176_v20, 9 }
 0x116   : > { %v452_v34 = vshrl.u32 %v357_v26, 16  ;;  %v455_v36 = vshll.u32 %v357_v26, 16  ;;  %v436_v38 = vshrl.u32 %v355_v31, 16  ;;  %v439_v51 = vshll.u32 %v355_v31, 16 }
 0x117   : > { %v338_v39 = vpop.permute.xlu1 %337  ;;  %v334_v44 = vpop.permute.xlu0 %333 }
 0x118   : > { %v454_v42 = vrot.slane %v452_v34, 7  ;;  %v358_v43 = vmax.bf16 %v338_v39, %v4096_v13  ;;  %v438_v50 = vrot.slane %v436_v38, 7  ;;  %v356_v52 = vmax.bf16 %v334_v44, %v4106_v15  ;;  %v542_v44 = vld [vmem:[#allocation2 + $0x28] sm:$0xf] }
 0x11a   : > { %v457_v55 = vor.u32 %v455_v36, %v454_v42  ;;  %v458_v13 = vrot.slane %v454_v42, 4  ;;  %v460_v57 = vshrl.u32 %v358_v43, 16  ;;  %v463_v58 = vshll.u32 %v358_v43, 16  ;;  %v551_v43 = vld [vmem:[#allocation2 + $0x34] sm:$0x1] }
 0x11b   : > { %v441_v59 = vor.u32 %v439_v51, %v438_v50  ;;  %v442_v60 = vrot.slane %v438_v50, 4  ;;  %v444_v61 = vshrl.u32 %v356_v52, 16  ;;  %v447_v62 = vshll.u32 %v356_v52, 16  ;;  %v342_v63 = vpop.permute.xlu1 %341  ;;  %v340_v7 = vpop.permute.xlu0 %339 }
 0x11c   : > { %v531_v2 = vsel %vm4211_vm14, %v457_v55, %v530_v37  ;;  %v534_v3 = vsel %vm4090_vm6, %v458_v13, %v533_v41  ;;  %v462_v15 = vrot.slane %v460_v57, 7  ;;  %v360_v6 = vmax.bf16 %v342_v63, %v4120_v28  ;;  %v548_v37 = vld [vmem:[#allocation2 + $0x30] sm:$0xf]  ;;  %v545_v55 = vld [vmem:[#allocation2 + $0x2c] sm:$0x1] }
 0x11d   : > { %532 = vst [vmem:[#allocation2 + $0x18] sm:$0xf] %v531_v2  ;;  %535 = vst [vmem:[#allocation2 + $0x1c] sm:$0x1] %v534_v3  ;;  %v519_v8 = vsel %vm4211_vm14, %v441_v59, %v518_v49  ;;  %v522_v10 = vsel %vm4090_vm6, %v442_v60, %v521_v56  ;;  %v446_v17 = vrot.slane %v444_v61, 7  ;;  %v359_v18 = vmax.bf16 %v340_v7, %v4130_v35 }
 0x11e   : > { %520 = vst [vmem:[#allocation2 + $0x8] sm:$0xf] %v519_v8  ;;  %523 = vst [vmem:[#allocation2 + $0xc] sm:$0x1] %v522_v10  ;;  %v465_v19 = vor.u32 %v463_v58, %v462_v15  ;;  %v466_v21 = vrot.slane %v462_v15, 4  ;;  %v476_v28 = vshrl.u32 %v360_v6, 16 }
 0x11f   : > { %v479_v25 = vshll.u32 %v360_v6, 16  ;;  %v449_v26 = vor.u32 %v447_v62, %v446_v17  ;;  %v450_v27 = vrot.slane %v446_v17, 4  ;;  %v468_v30 = vshrl.u32 %v359_v18, 16  ;;  %v346_v33 = vpop.permute.xlu1 %345  ;;  %v344_v39 = vpop.permute.xlu0 %343  ;;  %v560_v58 = vld [vmem:[#allocation2 + $0x40] sm:$0xf] }
 0x120   : > { %v471_v31 = vshll.u32 %v359_v18, 16  ;;  %v537_v34 = vsel %vm4211_vm14, %v465_v19, %v536_v4  ;;  %v540_v36 = vsel %vm4090_vm6, %v466_v21, %v539_v11  ;;  %v478_v35 = vrot.slane %v476_v28, 7  ;;  %v563_v59 = vld [vmem:[#allocation2 + $0x44] sm:$0x1]  ;;  %v554_v7 = vld [vmem:[#allocation2 + $0x38] sm:$0xf] }
 0x121   : > { %v362_v38 = vmax.bf16 %v346_v33, %v4146_v48  ;;  %538 = vst [vmem:[#allocation2 + $0x20] sm:$0xf] %v537_v34  ;;  %541 = vst [vmem:[#allocation2 + $0x24] sm:$0x1] %v540_v36  ;;  %v525_v41 = vsel %vm4211_vm14, %v449_v26, %v524_v16  ;;  %v528_v42 = vsel %vm4090_vm6, %v450_v27, %v527_v24  ;;  %v470_v49 = vrot.slane %v468_v30, 7 }
 0x122   : > { %v361_v50 = vmax.bf16 %v344_v39, %v4154_v53  ;;  %526 = vst [vmem:[#allocation2 + $0x10] sm:$0xf] %v525_v41  ;;  %529 = vst [vmem:[#allocation2 + $0x14] sm:$0x1] %v528_v42  ;;  %v481_v51 = vor.u32 %v479_v25, %v478_v35  ;;  %v482_v52 = vrot.slane %v478_v35, 4  ;;  %v1362_v4 = vor.u32 %v4216_v54, %v4206_v45 }
 0x123   : > { %v492_v48 = vshrl.u32 %v362_v38, 16  ;;  %v495_v13 = vshll.u32 %v362_v38, 16  ;;  %v473_v56 = vor.u32 %v471_v31, %v470_v49  ;;  %v474_v57 = vrot.slane %v470_v49, 4  ;;  %v557_v18 = vld [vmem:[#allocation2 + $0x3c] sm:$0x1] }
 0x124   : > { %v484_v60 = vshrl.u32 %v361_v50, 16  ;;  %v487_v61 = vshll.u32 %v361_v50, 16  ;;  %v549_v62 = vsel %vm4211_vm14, %v481_v51, %v548_v37  ;;  %v552_v63 = vsel %vm4090_vm6, %v482_v52, %v551_v43  ;;  %v4242_v2 = vld [vmem:[#allocation2 + $0x18] sm:$0xf]  ;;  %v4244_v3 = vld [vmem:[#allocation2 + $0x1c] sm:$0x1] }
 0x125   : > { %v494_v53 = vrot.slane %v492_v48, 7  ;;  %550 = vst [vmem:[#allocation2 + $0x30] sm:$0xf] %v549_v62  ;;  %553 = vst [vmem:[#allocation2 + $0x34] sm:$0x1] %v552_v63  ;;  %v543_v15 = vsel %vm4211_vm14, %v473_v56, %v542_v44  ;;  %v546_v6 = vsel %vm4090_vm6, %v474_v57, %v545_v55  ;;  %v870_v10 = vshrl.u32 %v4242_v2, 16 }
 0x126   : > { %v486_v8 = vrot.slane %v484_v60, 7  ;;  %v4253_v11 = vld [vmem:[#allocation2 + $0x8] sm:$0xf]  ;;  %544 = vst [vmem:[#allocation2 + $0x28] sm:$0xf] %v543_v15  ;;  %v873_v19 = vshll.u32 %v4242_v2, 16 }
 0x127   : > { %547 = vst [vmem:[#allocation2 + $0x2c] sm:$0x1] %v546_v6  ;;  %v497_v16 = vor.u32 %v495_v13, %v494_v53  ;;  %v498_v17 = vrot.slane %v494_v53, 4  ;;  %v879_v21 = vshll.u32 %v4244_v3, 16  ;;  %v872_v25 = vrot.slane %v870_v10, 4 }
 0x128   : > { %v489_v24 = vor.u32 %v487_v61, %v486_v8  ;;  %v490_v28 = vrot.slane %v486_v8, 4  ;;  %v826_v26 = vld [vmem:[#allocation2 + $0xc] sm:$0x1]  ;;  %v842_v27 = vshrl.u32 %v4253_v11, 16  ;;  %v4262_v33 = vld [vmem:[#allocation2 + $0x20] sm:$0xf] }
 0x129   : > { %v561_v30 = vsel %vm4211_vm14, %v497_v16, %v560_v58  ;;  %v564_v31 = vsel %vm4090_vm6, %v498_v17, %v563_v59  ;;  %v832_v34 = vld [vmem:[#allocation2 + $0x24] sm:$0x1]  ;;  %v875_v36 = vrot.slane %v873_v19, 5  ;;  %v881_v37 = vrot.slane %v879_v21, 5  ;;  %v4270_v42 = vld [vmem:[#allocation2 + $0x10] sm:$0xf] }
 0x12a   : > { %562 = vst [vmem:[#allocation2 + $0x40] sm:$0xf] %v561_v30  ;;  %565 = vst [vmem:[#allocation2 + $0x44] sm:$0x1] %v564_v31  ;;  %v555_v35 = vsel %vm4211_vm14, %v489_v24, %v554_v7  ;;  %v558_v38 = vsel %vm4090_vm6, %v490_v28, %v557_v18  ;;  %v884_v39 = vshrl.u32 %v4262_v33, 16  ;;  %v887_v41 = vshll.u32 %v4262_v33, 16 }
 0x12b   : > { %556 = vst [vmem:[#allocation2 + $0x38] sm:$0xf] %v555_v35  ;;  %559 = vst [vmem:[#allocation2 + $0x3c] sm:$0x1] %v558_v38  ;;  %v876_v43 = vor.u32 %v875_v36, %v872_v25  ;;  %v893_v44 = vshll.u32 %v832_v34, 16  ;;  %v844_v50 = vrot.slane %v842_v27, 4 }
 0x12c   : > { %v828_v49 = vld [vmem:[#allocation2 + $0x14] sm:$0x1]  ;;  %v845_v51 = vshll.u32 %v4253_v11, 16  ;;  %v886_v52 = vrot.slane %v884_v39, 4  ;;  %v889_v47 = vrot.slane %v887_v41, 5  ;;  %v851_v55 = vshll.u32 %v826_v26, 16  ;;  %vm4598_vm6 = vmand %vm1604_vm2, %vm403_vm5 }
 0x12d   : > { %v856_v12 = vshrl.u32 %v4270_v42, 16  ;;  %v877_v48 = vrot.slane %v876_v43, 4  ;;  %v895_v13 = vrot.slane %v893_v44, 5  ;;  %v859_v57 = vshll.u32 %v4270_v42, 16  ;;  %v4281_v21 = vld [vmem:[#allocation2 + $0x28] sm:$0xf]  ;;  %vm4674_vm2 = vmand %vm1602_vm7, %vm403_vm5 }
 0x12e   : > { %v847_v56 = vrot.slane %v845_v51, 5  ;;  %v890_v58 = vor.u32 %v889_v47, %v886_v52  ;;  %v853_v59 = vrot.slane %v851_v55, 5  ;;  %v865_v61 = vshll.u32 %v828_v49, 16  ;;  %v4288_v30 = vld [vmem:[#allocation2 + $0x2c] sm:$0x1] }
 0x12f   : > { %v858_v60 = vrot.slane %v856_v12, 4  ;;  %v882_v62 = vsel %vm4178_vm12, %v877_v48, %v881_v37  ;;  %v861_v53 = vrot.slane %v859_v57, 5  ;;  %v3131_v15 = vrot.slane %v4242_v2, 9 }
 0x130   : > { %v848_v63 = vor.u32 %v847_v56, %v844_v50  ;;  %v891_v6 = vrot.slane %v890_v58, 4  ;;  %v867_v7 = vrot.slane %v865_v61, 5  ;;  %v979_v8 = vrot.slane %v4244_v3, 5  ;;  %v4290_v3 = vld [vmem:[#allocation2 + $0x30] sm:$0xf] }
 0x131   : > { %v3132_v10 = vrot.slane %v4262_v33, 9  ;;  %v862_v17 = vor.u32 %v861_v53, %v858_v60  ;;  %v983_v18 = vrot.slane %v832_v34, 5  ;;  %v3129_v19 = vrot.slane %v4253_v11, 9 }
 0x132   : > { %v849_v16 = vrot.slane %v848_v63, 4  ;;  %v896_v24 = vsel %vm4178_vm12, %v891_v6, %v895_v13  ;;  %v980_v28 = vsel %vm4187_vm13, %v3131_v15, %v979_v8  ;;  %v971_v25 = vrot.slane %v826_v26, 5  ;;  %v836_v26 = vld [vmem:[#allocation2 + $0x34] sm:$0x1]  ;;  %v4305_v52 = vld [vmem:[#allocation2 + $0x38] sm:$0xf] }
 0x133   : > { %v3130_v27 = vrot.slane %v4270_v42, 9  ;;  %v3142_v31 = vcombine.low %v882_v62, %v896_v24  ;;  %v863_v36 = vrot.slane %v862_v17, 4  ;;  %v984_v37 = vsel %vm4187_vm13, %v3132_v10, %v983_v18  ;;  %v838_v48 = vld [vmem:[#allocation2 + $0x3c] sm:$0x1]  ;;  %v4310_v13 = vld [vmem:[#allocation2 + $0x40] sm:$0xf] }
 0x134   : > { %v854_v34 = vsel %vm4178_vm12, %v849_v16, %v853_v59  ;;  %v3146_v35 = vcombine.low %v980_v28, %v984_v37  ;;  %v972_v38 = vsel %vm4187_vm13, %v3129_v19, %v971_v25  ;;  %v975_v39 = vrot.slane %v828_v49, 5  ;;  %v840_v15 = vld [vmem:[#allocation2 + $0x44] sm:$0x1] }
 0x135   : > { %v898_v41 = vshrl.u32 %v4281_v21, 16  ;;  %1027 = vrot.lane.b32.xlu1 %v3142_v31, %s3785_s26  ;;  %v868_v43 = vsel %vm4178_vm12, %v863_v36, %v867_v7  ;;  %v901_v44 = vshll.u32 %v4281_v21, 16  ;;  %v907_v50 = vshll.u32 %v4288_v30, 16 }
 0x136   : > { %v912_v51 = vshrl.u32 %v4290_v3, 16  ;;  %v3141_v47 = vcombine.low %v854_v34, %v868_v43  ;;  %v976_v49 = vsel %vm4187_vm13, %v3130_v27, %v975_v39  ;;  %v915_v12 = vshll.u32 %v4290_v3, 16 }
 0x137   : > { %v900_v55 = vrot.slane %v898_v41, 4  ;;  %v3145_v56 = vcombine.low %v972_v38, %v976_v49  ;;  %v903_v57 = vrot.slane %v901_v44, 5  ;;  %v909_v58 = vrot.slane %v907_v50, 5 }
 0x138   : > { %v914_v59 = vrot.slane %v912_v51, 4  ;;  %1025 = vrot.lane.b32.xlu0 %v3141_v47, %s3785_s26  ;;  %v917_v60 = vrot.slane %v915_v12, 5  ;;  %v921_v61 = vshll.u32 %v836_v26, 16  ;;  %v926_v62 = vshrl.u32 %v4305_v52, 16  ;;  %v4326_v51 = vld [vmem:[#allocation2 + $0x8] sm:$0xf] }
 0x139   : > { %v929_v63 = vshll.u32 %v4305_v52, 16  ;;  %1047 = vrot.lane.b32.xlu1 %v3146_v35, %s3786_s23  ;;  %v904_v53 = vor.u32 %v903_v57, %v900_v55  ;;  %v935_v6 = vshll.u32 %v838_v48, 16  ;;  %v940_v7 = vshrl.u32 %v4310_v13, 16 }
 0x13a   : > { %v943_v8 = vshll.u32 %v4310_v13, 16  ;;  %v918_v10 = vor.u32 %v917_v60, %v914_v59  ;;  %v923_v16 = vrot.slane %v921_v61, 5  ;;  %v928_v17 = vrot.slane %v926_v62, 4 }
 0x13b   : > { %v931_v18 = vrot.slane %v929_v63, 5  ;;  %v905_v19 = vrot.slane %v904_v53, 4  ;;  %v937_v24 = vrot.slane %v935_v6, 5  ;;  %v942_v28 = vrot.slane %v940_v7, 4  ;;  %v572_v53 = vld [vmem:[#allocation2 + $0x14] sm:$0x1] }
 0x13c   : > { %v945_v25 = vrot.slane %v943_v8, 5  ;;  %1045 = vrot.lane.b32.xlu0 %v3145_v56, %s3786_s23  ;;  %v919_v27 = vrot.slane %v918_v10, 4  ;;  %v949_v34 = vshll.u32 %v840_v15, 16  ;;  %v3133_v36 = vrot.slane %v4281_v21, 9  ;;  %v570_v56 = vld [vmem:[#allocation2 + $0xc] sm:$0x1] }
 0x13d   : > { %v932_v31 = vor.u32 %v931_v18, %v928_v17  ;;  %v910_v37 = vsel %vm4178_vm12, %v905_v19, %v909_v58  ;;  %v987_v38 = vrot.slane %v4288_v30, 5  ;;  %v3134_v39 = vrot.slane %v4290_v3, 9  ;;  %v4345_v10 = vld [vmem:[#allocation2 + $0x18] sm:$0xf]  ;;  %v574_v18 = vld [vmem:[#allocation2 + $0x1c] sm:$0x1] }
 0x13e   : > { %v946_v35 = vor.u32 %v945_v25, %v942_v28  ;;  %v924_v41 = vsel %vm4178_vm12, %v919_v27, %v923_v16  ;;  %v951_v44 = vrot.slane %v949_v34, 5  ;;  %v991_v50 = vrot.slane %v836_v26, 5  ;;  %v4336_v26 = vld [vmem:[#allocation2 + $0x10] sm:$0xf] }
 0x13f   : > { %v933_v43 = vrot.slane %v932_v31, 4  ;;  %v3143_v47 = vcombine.low %v910_v37, %v924_v41  ;;  %v988_v55 = vsel %vm4187_vm13, %v3133_v36, %v987_v38  ;;  %v3135_v12 = vrot.slane %v4305_v52, 9 }
 0x140   : > { %v947_v49 = vrot.slane %v946_v35, 4  ;;  %v992_v57 = vsel %vm4187_vm13, %v3134_v39, %v991_v50  ;;  %v995_v58 = vrot.slane %v838_v48, 5  ;;  %v3136_v59 = vrot.slane %v4310_v13, 9 }
 0x141   : > { %v938_v30 = vsel %vm4178_vm12, %v933_v43, %v937_v24  ;;  %1029 = vrot.lane.b32.xlu0 %v3143_v47, %s3785_s26  ;;  %v3147_v61 = vcombine.low %v988_v55, %v992_v57  ;;  %v999_v62 = vrot.slane %v840_v15, 5  ;;  %v601_v63 = vshrl.u32 %v4326_v51, 16  ;;  %v4358_v57 = vld [vmem:[#allocation2 + $0x20] sm:$0xf] }
 0x142   : > { %v952_v60 = vsel %vm4178_vm12, %v947_v49, %v951_v44  ;;  %v996_v7 = vsel %vm4187_vm13, %v3135_v12, %v995_v58  ;;  %v604_v48 = vshll.u32 %v4326_v51, 16  ;;  %v610_v8 = vshll.u32 %v570_v56, 16 }
 0x143   : > { %v3144_v6 = vcombine.low %v938_v30, %v952_v60  ;;  %v1000_v16 = vsel %vm4187_vm13, %v3136_v59, %v999_v62  ;;  %v603_v17 = vrot.slane %v601_v63, 4  ;;  %v615_v19 = vshrl.u32 %v4336_v26, 16  ;;  %v4363_v62 = vld [vmem:[#allocation2 + $0x24] sm:$0x1]  ;;  %v4365_v63 = vld [vmem:[#allocation2 + $0x28] sm:$0xf] }
 0x144   : > { %v618_v15 = vshll.u32 %v4336_v26, 16  ;;  %v3148_v24 = vcombine.low %v996_v7, %v1000_v16  ;;  %v606_v28 = vrot.slane %v604_v48, 5  ;;  %v612_v25 = vrot.slane %v610_v8, 5 }
 0x145   : > { %1031 = vrot.lane.b32.xlu1 %v3144_v6, %s3785_s26  ;;  %v624_v27 = vshll.u32 %v572_v53, 16  ;;  %1049 = vrot.lane.b32.xlu0 %v3147_v61, %s3786_s23  ;;  %v617_v31 = vrot.slane %v615_v19, 4  ;;  %v629_v36 = vshrl.u32 %v4345_v10, 16  ;;  %v632_v37 = vshll.u32 %v4345_v10, 16 }
 0x146   : > { %v620_v34 = vrot.slane %v618_v15, 5  ;;  %v607_v35 = vor.u32 %v606_v28, %v603_v17  ;;  %v638_v39 = vshll.u32 %v574_v18, 16  ;;  %v3110_v41 = vrot.slane %v4326_v51, 9  ;;  %v578_v17 = vld [vmem:[#allocation2 + $0x2c] sm:$0x1] }
 0x147   : > { %v626_v38 = vrot.slane %v624_v27, 5  ;;  %v631_v44 = vrot.slane %v629_v36, 4  ;;  %v634_v50 = vrot.slane %v632_v37, 5  ;;  %v723_v47 = vrot.slane %v570_v56, 5  ;;  %v4385_v28 = vld [vmem:[#allocation2 + $0x30] sm:$0xf] }
 0x148   : > { %v621_v43 = vor.u32 %v620_v34, %v617_v31  ;;  %v608_v49 = vrot.slane %v607_v35, 4  ;;  %v640_v55 = vrot.slane %v638_v39, 5  ;;  %v3111_v12 = vrot.slane %v4336_v26, 9  ;;  %v580_v27 = vld [vmem:[#allocation2 + $0x34] sm:$0x1] }
 0x149   : > { %1051 = vrot.lane.b32.xlu1 %v3148_v24, %s3786_s23  ;;  %v727_v30 = vrot.slane %v572_v53, 5  ;;  %v635_v59 = vor.u32 %v634_v50, %v631_v44  ;;  %v724_v60 = vsel %vm4187_vm13, %v3110_v41, %v723_v47  ;;  %v3112_v61 = vrot.slane %v4345_v10, 9  ;;  %v4391_v31 = vld [vmem:[#allocation2 + $0x38] sm:$0xf]  ;;  %v582_v50 = vld [vmem:[#allocation2 + $0x3c] sm:$0x1] }
 0x14a   : > { %v622_v58 = vrot.slane %v621_v43, 4  ;;  %v613_v56 = vsel %vm4178_vm12, %v608_v49, %v612_v25  ;;  %v3125_v6 = vcombine.low %v4202_v40, %v724_v60  ;;  %v731_v7 = vrot.slane %v574_v18, 5 }
 0x14b   : > { %v728_v53 = vsel %vm4187_vm13, %v3111_v12, %v727_v30  ;;  %v3121_v48 = vcombine.low %v599_v5, %v613_v56  ;;  %v636_v16 = vrot.slane %v635_v59, 4  ;;  %v643_v19 = vshrl.u32 %v4358_v57, 16 }
 0x14c   : > { %v627_v8 = vsel %vm4178_vm12, %v622_v58, %v626_v38  ;;  %v732_v40 = vsel %vm4187_vm13, %v3112_v61, %v731_v7  ;;  %v646_v15 = vshll.u32 %v4358_v57, 16  ;;  %v652_v18 = vshll.u32 %v4363_v62, 16 }
 0x14d   : > { %v657_v24 = vshrl.u32 %v4365_v63, 16  ;;  %773 = vrot.lane.b32.xlu0 %v3121_v48, %s3785_s26  ;;  %v641_v14 = vsel %vm4178_vm12, %v636_v16, %v640_v55  ;;  %v3126_v23 = vcombine.low %v728_v53, %v732_v40  ;;  %v645_v5 = vrot.slane %v643_v19, 4 }
 0x14e   : > { %v660_v25 = vshll.u32 %v4365_v63, 16  ;;  %v3122_v34 = vcombine.low %v627_v8, %v641_v14  ;;  %v648_v36 = vrot.slane %v646_v15, 5  ;;  %v654_v37 = vrot.slane %v652_v18, 5 }
 0x14f   : > { %v659_v35 = vrot.slane %v657_v24, 4  ;;  %v666_v39 = vshll.u32 %v578_v17, 16  ;;  %v671_v41 = vshrl.u32 %v4385_v28, 16  ;;  %v674_v43 = vshll.u32 %v4385_v28, 16 }
 0x150   : > { %v662_v38 = vrot.slane %v660_v25, 5  ;;  %775 = vrot.lane.b32.xlu1 %v3122_v34, %s3785_s26  ;;  %v649_v44 = vor.u32 %v648_v36, %v645_v5  ;;  %v680_v47 = vshll.u32 %v580_v27, 16  ;;  %v685_v49 = vshrl.u32 %v4391_v31, 16  ;;  %v4407_v25 = vld [vmem:[#allocation2 + $0x10] sm:$0xf] }
 0x151   : > { %v688_v55 = vshll.u32 %v4391_v31, 16  ;;  %793 = vrot.lane.b32.xlu0 %v3125_v6, %s3786_s23  ;;  %v668_v30 = vrot.slane %v666_v39, 5  ;;  %v673_v58 = vrot.slane %v671_v41, 4  ;;  %v676_v59 = vrot.slane %v674_v43, 5  ;;  %v4419_v41 = vld [vmem:[#allocation2 + $0x18] sm:$0xf] }
 0x152   : > { %v663_v12 = vor.u32 %v662_v38, %v659_v35  ;;  %v650_v60 = vrot.slane %v649_v44, 4  ;;  %v682_v61 = vrot.slane %v680_v47, 5  ;;  %v687_v56 = vrot.slane %v685_v49, 4  ;;  %v4412_v35 = vld [vmem:[#allocation2 + $0x14] sm:$0x1] }
 0x153   : > { %v690_v53 = vrot.slane %v688_v55, 5  ;;  %v677_v48 = vor.u32 %v676_v59, %v673_v58  ;;  %v694_v8 = vshll.u32 %v582_v50, 16  ;;  %v3113_v16 = vrot.slane %v4358_v57, 9  ;;  %v4424_v49 = vld [vmem:[#allocation2 + $0x1c] sm:$0x1] }
 0x154   : > { %v664_v7 = vrot.slane %v663_v12, 4  ;;  %795 = vrot.lane.b32.xlu1 %v3126_v23, %s3786_s23  ;;  %v655_v19 = vsel %vm4178_vm12, %v650_v60, %v654_v37  ;;  %v735_v6 = vrot.slane %v4363_v62, 5  ;;  %v3114_v15 = vrot.slane %v4365_v63, 9  ;;  %v4431_v59 = vld [vmem:[#allocation2 + $0x20] sm:$0xf] }
 0x155   : > { %v691_v40 = vor.u32 %v690_v53, %v687_v56  ;;  %v678_v24 = vrot.slane %v677_v48, 4  ;;  %v696_v14 = vrot.slane %v694_v8, 5  ;;  %v739_v5 = vrot.slane %v578_v17, 5  ;;  %v4437_v53 = vld [vmem:[#allocation2 + $0x28] sm:$0xf] }
 0x156   : > { %v669_v18 = vsel %vm4178_vm12, %v664_v7, %v668_v30  ;;  %v736_v23 = vsel %vm4187_vm13, %v3113_v16, %v735_v6  ;;  %v3115_v37 = vrot.slane %v4385_v28, 9  ;;  %v743_v39 = vrot.slane %v580_v27, 5  ;;  %v4441_v16 = vld [vmem:[#allocation2 + $0x24] sm:$0x1] }
 0x157   : > { %v3123_v34 = vcombine.low %v655_v19, %v669_v18  ;;  %v692_v36 = vrot.slane %v691_v40, 4  ;;  %v683_v62 = vsel %vm4178_vm12, %v678_v24, %v682_v61  ;;  %v740_v38 = vsel %vm4187_vm13, %v3114_v15, %v739_v5  ;;  %v1248_v15 = vld [vmem:[#allocation2 + $0x2c] sm:$0x1] }
 0x158   : > { %v3116_v17 = vrot.slane %v4391_v31, 9  ;;  %v3127_v44 = vcombine.low %v736_v23, %v740_v38  ;;  %v747_v47 = vrot.slane %v582_v50, 5  ;;  %v1258_v55 = vshrl.u32 %v4407_v25, 16 }
 0x159   : > { %777 = vrot.lane.b32.xlu0 %v3123_v34, %s3785_s26  ;;  %v697_v43 = vsel %vm4178_vm12, %v692_v36, %v696_v14  ;;  %v744_v30 = vsel %vm4187_vm13, %v3115_v37, %v743_v39  ;;  %v1261_v27 = vshll.u32 %v4407_v25, 16  ;;  %v1267_v58 = vshll.u32 %v4412_v35, 16 }
 0x15a   : > { %v3124_v12 = vcombine.low %v683_v62, %v697_v43  ;;  %v748_v60 = vsel %vm4187_vm13, %v3116_v17, %v747_v47  ;;  %v1260_v61 = vrot.slane %v1258_v55, 4  ;;  %v1272_v50 = vshrl.u32 %v4419_v41, 16 }
 0x15b   : > { %v1275_v56 = vshll.u32 %v4419_v41, 16  ;;  %v3128_v7 = vcombine.low %v744_v30, %v748_v60  ;;  %v1263_v48 = vrot.slane %v1261_v27, 5  ;;  %v1281_v8 = vshll.u32 %v4424_v49, 16 }
 0x15c   : > { %779 = vrot.lane.b32.xlu1 %v3124_v12, %s3785_s26  ;;  %v1365_v19 = vshll.u32 %v4193_v32, 16  ;;  %v1274_v40 = vrot.slane %v1272_v50, 4  ;;  %v1286_v18 = vshrl.u32 %v4431_v59, 16  ;;  %v1289_v24 = vshll.u32 %v4431_v59, 16 }
 0x15d   : > { %797 = vrot.lane.b32.xlu0 %v3127_v44, %s3786_s23  ;;  %v1277_v6 = vrot.slane %v1275_v56, 5  ;;  %v1264_v14 = vor.u32 %v1263_v48, %v1260_v61  ;;  %v1269_v5 = vrot.slane %v1267_v58, 5  ;;  %v1283_v34 = vrot.slane %v1281_v8, 5  ;;  %v4464_v8 = vld [vmem:[#allocation2 + $0x30] sm:$0xf] }
 0x15e   : > { %v1300_v36 = vshrl.u32 %v4437_v53, 16  ;;  %v1288_v37 = vrot.slane %v1286_v18, 4  ;;  %v1291_v62 = vrot.slane %v1289_v24, 5  ;;  %v1303_v38 = vshll.u32 %v4437_v53, 16 }
 0x15f   : > { %v1278_v23 = vor.u32 %v1277_v6, %v1274_v40  ;;  %v1265_v39 = vrot.slane %v1264_v14, 4  ;;  %v1295_v17 = vshll.u32 %v4441_v16, 16  ;;  %v1309_v44 = vshll.u32 %v1248_v15, 16 }
 0x160   : > { %799 = vrot.lane.b32.xlu1 %v3128_v7, %s3786_s23  ;;  %v1302_v43 = vrot.slane %v1300_v36, 4  ;;  %v1292_v55 = vor.u32 %v1291_v62, %v1288_v37  ;;  %v1305_v12 = vrot.slane %v1303_v38, 5  ;;  %v3159_v30 = vrot.slane %v4407_v25, 9  ;;  %v1250_v36 = vld [vmem:[#allocation2 + $0x34] sm:$0x1] }
 0x161   : > { %v1279_v47 = vrot.slane %v1278_v23, 4  ;;  %v1270_v27 = vsel %vm4178_vm12, %v1265_v39, %v1269_v5  ;;  %v1387_v58 = vrot.slane %v4412_v35, 5  ;;  %v3160_v60 = vrot.slane %v4419_v41, 9  ;;  %v4466_v35 = vld [vmem:[#allocation2 + $0x38] sm:$0xf] }
 0x162   : > { %v4459_v61 = vrot.slane %v1362_v4, 4  ;;  %v1293_v56 = vrot.slane %v1292_v55, 4  ;;  %v1306_v7 = vor.u32 %v1305_v12, %v1302_v43  ;;  %v1391_v48 = vrot.slane %v4424_v49, 5  ;;  %v1252_v62 = vld [vmem:[#allocation2 + $0x3c] sm:$0x1] }
 0x163   : > { %v1284_v50 = vsel %vm4178_vm12, %v1279_v47, %v1283_v34  ;;  %v1297_v6 = vrot.slane %v1295_v17, 5  ;;  %v1311_v18 = vrot.slane %v1309_v44, 5  ;;  %v4468_v24 = vrot.slane %v1365_v19, 5  ;;  %v4485_v17 = vld [vmem:[#allocation2 + $0x40] sm:$0xf] }
 0x164   : > { %v3171_v40 = vcombine.low %v1270_v27, %v1284_v50  ;;  %v1307_v14 = vrot.slane %v1306_v7, 4  ;;  %v1388_v45 = vsel %vm4187_vm13, %v3159_v30, %v1387_v58  ;;  %v3161_v54 = vrot.slane %v4431_v59, 9  ;;  %v1254_v47 = vld [vmem:[#allocation2 + $0x44] sm:$0x1] }
 0x165   : > { %v3162_v4 = vrot.slane %v4437_v53, 9  ;;  %v1298_v49 = vsel %vm4178_vm12, %v1293_v56, %v1297_v6  ;;  %v1395_v5 = vrot.slane %v4441_v16, 5  ;;  %v1399_v34 = vrot.slane %v1248_v15, 5 }
 0x166   : > { %1441 = vrot.lane.b32.xlu0 %v3171_v40, %s3785_s26  ;;  %v1314_v19 = vshrl.u32 %v4464_v8, 16  ;;  %v1312_v23 = vsel %vm4178_vm12, %v1307_v14, %v1311_v18  ;;  %v1392_v37 = vsel %vm4187_vm13, %v3160_v60, %v1391_v48  ;;  %v1317_v38 = vshll.u32 %v4464_v8, 16 }
 0x167   : > { %v1328_v39 = vshrl.u32 %v4466_v35, 16  ;;  %v3172_v43 = vcombine.low %v1298_v49, %v1312_v23  ;;  %v3175_v44 = vcombine.low %v1388_v45, %v1392_v37  ;;  %v1331_v15 = vshll.u32 %v4466_v35, 16  ;;  %v3521_v49 = vld [vmem:[#allocation7 + $0x4] sm:$0xfc]  }
 0x168   : > { %v1316_v16 = vrot.slane %v1314_v19, 4  ;;  %v1400_v55 = vsel %vm4187_vm13, %v3162_v4, %v1399_v34  ;;  %v1319_v12 = vrot.slane %v1317_v38, 5  ;;  %v1323_v30 = vshll.u32 %v1250_v36, 16 }
 0x169   : > { %v1330_v27 = vrot.slane %v1328_v39, 4  ;;  %1443 = vrot.lane.b32.xlu1 %v3172_v43, %s3785_s26  ;;  %v1333_v58 = vrot.slane %v1331_v15, 5  ;;  %v1337_v60 = vshll.u32 %v1252_v62, 16  ;;  %v1342_v50 = vshrl.u32 %v4485_v17, 16 }
 0x16a   : > { %1461 = vrot.lane.b32.xlu0 %v3175_v44, %s3786_s23  ;;  %v1345_v56 = vshll.u32 %v4485_v17, 16  ;;  %v1396_v7 = vsel %vm4187_vm13, %v3161_v54, %v1395_v5  ;;  %v1320_v48 = vor.u32 %v1319_v12, %v1316_v16  ;;  %v1351_v40 = vshll.u32 %v1254_v47, 16 }
 0x16b   : > { %v1368_v6 = vsel %vm4178_vm12, %v4459_v61, %v4468_v24  ;;  %v3176_v18 = vcombine.low %v1396_v7, %v1400_v55  ;;  %v1334_v14 = vor.u32 %v1333_v58, %v1330_v27  ;;  %v1344_v45 = vrot.slane %v1342_v50, 4 }
 0x16c   : > { %v1347_v4 = vrot.slane %v1345_v56, 5  ;;  %v1321_v34 = vrot.slane %v1320_v48, 4  ;;  %v1325_v19 = vrot.slane %v1323_v30, 5  ;;  %v3163_v23 = vrot.slane %v4464_v8, 9  ;;  %v3522_v30 = vld [vmem:[#allocation7] sm:$0x3f]  }
 0x16d   : > { %v3164_v37 = vrot.slane %v4466_v35, 9  ;;  %1463 = vrot.lane.b32.xlu1 %v3176_v18, %s3786_s23  ;;  %v1335_v54 = vrot.slane %v1334_v14, 4  ;;  %v1339_v5 = vrot.slane %v1337_v60, 5  ;;  %v1407_v39 = vrot.slane %v1252_v62, 5  ;;  %v3527_v14 = vld [vmem:[#allocation7 + $0xc] sm:$0x3f]  }
 0x16e   : > { %v1348_v38 = vor.u32 %v1347_v4, %v1344_v45  ;;  %v1326_v61 = vsel %vm4178_vm12, %v1321_v34, %v1325_v19  ;;  %v1353_v24 = vrot.slane %v1351_v40, 5  ;;  %v1403_v43 = vrot.slane %v1250_v36, 5 }
 0x16f   : > { %v3165_v44 = vrot.slane %v4485_v17, 9  ;;  %v1340_v16 = vsel %vm4178_vm12, %v1335_v54, %v1339_v5  ;;  %v1411_v55 = vrot.slane %v1254_v47, 5  ;;  %v1080_v12 = vrot.slane %v3521_v49, 2 }
 0x170   : > { %v1349_v15 = vrot.slane %v1348_v38, 4  ;;  %v3173_v27 = vcombine.low %v1326_v61, %v1340_v16  ;;  %v1408_v58 = vsel %vm4187_vm13, %v3164_v37, %v1407_v39  ;;  %v1416_v36 = vsel %vm4187_vm13, %v3166_v9, %v1415_v46 }
 0x171   : > { %3418 = vmatprep.subr.msk.bf16.mxu0 %vm1090_vm15, %v1080_v12  ;;  %v1092_v47 = vsel %vm1090_vm15, %v1080_v12, 0  ;;  %v1404_v50 = vsel %vm4187_vm13, %v3163_v23, %v1403_v43  ;;  %v3140_v56 = vcombine.low %v4305_v52, %v4310_v13  ;;  %v1412_v20 = vsel %vm4187_vm13, %v3165_v44, %v1411_v55  ;;  %v3554_v23 = vld [vmem:[#allocation2] sm:$0xf] }
 0x172   : > { %v1354_v62 = vsel %vm4178_vm12, %v1349_v15, %v1353_v24  ;;  %1445 = vrot.lane.b32.xlu0 %v3173_v27, %s3785_s26  ;;  %3321 = vmatpush3.bf16.msra.mxu0 %v1092_v47  ;;  %v3177_v32 = vcombine.low %v1404_v50, %v1408_v58  ;;  %v3139_v9 = vcombine.low %v4281_v21, %v4290_v3  ;;  %v1173_v18 = vsel %vm1090_vm15, %v3522_v30, 0 }
 0x173   : > { %v3174_v60 = vcombine.low %v1354_v62, %v1368_v6  ;;  %3419 = vmatprep.subr.msk.bf16.mxu0 %vm1090_vm15, %v3522_v30  ;;  %v3118_v46 = vcombine.low %v4336_v26, %v4345_v10  ;;  %v3120_v7 = vcombine.low %v4385_v28, %v4391_v31  ;;  %v3119_v52 = vcombine.low %v4358_v57, %v4365_v63 }
 0x174   : > { %v3168_v13 = vcombine.low %v4431_v59, %v4437_v53  ;;  %v3167_v48 = vcombine.low %v4407_v25, %v4419_v41  ;;  %v3169_v21 = vcombine.low %v4464_v8, %v4466_v35  ;;  %v3178_v3 = vcombine.low %v1412_v20, %v1416_v36  ;;  %v1620_v8 = vld [vmem:[#allocation3 + $0x18] sm:$0x1]  ;;  %v1651_v35 = vld [vmem:[#allocation3 + $0x1c] sm:$0x1] }
 0x175   : > { %1447 = vrot.lane.b32.xlu1 %v3174_v60, %s3785_s26  ;;  %v3138_v57 = vcombine.low %v4242_v2, %v4262_v33  ;;  %v3137_v28 = vcombine.low %v4253_v11, %v4270_v42  ;;  %v3117_v37 = vcombine.low %v3554_v23, %v4326_v51  ;;  %v1505_v43 = vsel %vm1090_vm15, %v3527_v14, 0  ;;  %v1626_v23 = vld [vmem:[#allocation3 + $0x28] sm:$0x1] }
 0x176   : > { %1465 = vrot.lane.b32.xlu0 %v3177_v32, %s3786_s23  ;;  %vm2076_vm5 = vcmask 130048  }
 0x179   : > { %1467 = vrot.lane.b32.xlu1 %v3178_v3, %s3786_s23 }
 0x1a7   : > { %v1028_v26 = vpop.permute.xlu1 %1027 }
 0x1a8   : > { %v1058_v31 = vsel %vm801_vm0, %v3138_v57, %v1028_v26  ;;  %v1611_v57 = vld [vmem:[#allocation3] sm:$0x1] }
 0x1aa   : > { %v1026_v10 = vpop.permute.xlu0 %1025 }
 0x1ab   : > { %v1048_v63 = vpop.permute.xlu1 %1047  ;;  %v1055_v25 = vsel %vm801_vm0, %v3137_v28, %v1026_v10  ;;  %v1652_v10 = vsel %vm4598_vm6, 0, %v1651_v35  ;;  %v1612_v28 = vsel %vm4073_vm4, 0, %v1611_v57 }
 0x1ac   : > { %v1068_v41 = vsel %vm814_vm1, %v1058_v31, %v1048_v63  ;;  %1653 = vst [vmem:[#allocation3 + $0x1c] sm:$0x1] %v1652_v10  ;;  %v1638_v63 = vld [vmem:[#allocation3 + $0x48] sm:$0x1]  ;;  %1613 = vst [vmem:[#allocation3] sm:$0x1] %v1612_v28 }
 0x1ad   : > { %v1639_v31 = vsel %vm4073_vm4, 0, %v1638_v63 }
 0x1ae   : > { %v1046_v40 = vpop.permute.xlu0 %1045  ;;  %1640 = vst [vmem:[#allocation3 + $0x48] sm:$0x1] %v1639_v31 }
 0x1af   : > { %v1066_v6 = vsel %vm814_vm1, %v1055_v25, %v1046_v40  ;;  %v1614_v25 = vld [vmem:[#allocation3 + $0x8] sm:$0x1]  ;;  %v1646_v40 = vsel %vm4598_vm6, 0, %v1645_v0 }
 0x1b0   : > { %3322 = vmatprep.mubr.msk.bf16.mxu0 %vm1081_vm3, %v1066_v6  ;;  %v1623_v6 = vld [vmem:[#allocation3 + $0x20] sm:$0x1]  ;;  %1647 = vst [vmem:[#allocation3 + $0xc] sm:$0x1] %v1646_v40 }
 0x1b1   : > { %3323 = vmatmul.mubr.msk.bf16.vlgmr.msra.gmra.mrb[0].mxu0 %vm1081_vm3, %v1068_v41  ;;  %v1615_v41 = vsel %vm4073_vm4, 0, %v1614_v25 }
 0x1b2   : > { %3331 = vmatpush3.bf16.msra.mxu0 %v1173_v18  ;;  %v1654_v18 = vld [vmem:[#allocation3 + $0x24] sm:$0x1]  ;;  %1616 = vst [vmem:[#allocation3 + $0x8] sm:$0x1] %v1615_v41 }
 0x1b3   : > { %v1030_v2 = vpop.permute.xlu0 %1029  ;;  %3420 = vmatprep.subr.msk.bf16.mxu0 %vm1090_vm15, %v3527_v14  ;;  %v1624_v14 = vsel %vm4073_vm4, 0, %v1623_v6  ;;  %v1802_v40 = vld [vmem:[#allocation3 + $0x1c] sm:$0x1] }
 0x1b4   : > { %v1061_v33 = vsel %vm801_vm0, %v3139_v9, %v1030_v2  ;;  %v1655_v2 = vsel %vm4598_vm6, 0, %v1654_v18  ;;  %1625 = vst [vmem:[#allocation3 + $0x20] sm:$0x1] %v1624_v14 }
 0x1b5   : > { %1656 = vst [vmem:[#allocation3 + $0x24] sm:$0x1] %v1655_v2  ;;  %v4659_v35 = vld [vmem:[#allocation3 + $0x48] sm:$0xf] }
 0x1b6   : > { %v2627_v2 = vshrl.u32 %v4659_v35, 16 }
 0x1b7   : > { %v1032_v11 = vpop.permute.xlu1 %1031  ;;  %v1050_v42 = vpop.permute.xlu0 %1049 }
 0x1b8   : > { %v1070_v45 = vsel %vm814_vm1, %v1061_v33, %v1050_v42  ;;  %v1064_v4 = vsel %vm801_vm0, %v3140_v56, %v1032_v11  ;;  %v1617_v11 = vld [vmem:[#allocation3 + $0x10] sm:$0x1]  ;;  %v1648_v33 = vld [vmem:[#allocation3 + $0x14] sm:$0x1] }
 0x1b9   : > { %3326 = vmatprep.mubr.msk.bf16.mxu0 %vm1081_vm3, %v1070_v45  ;;  %v1618_v42 = vsel %vm4073_vm4, 0, %v1617_v11  ;;  %v1649_v45 = vsel %vm4598_vm6, 0, %v1648_v33  ;;  %v2630_v11 = vshll.u32 %v4659_v35, 16 }
 0x1ba   : > { %1619 = vst [vmem:[#allocation3 + $0x10] sm:$0x1] %v1618_v42  ;;  %1650 = vst [vmem:[#allocation3 + $0x14] sm:$0x1] %v1649_v45  ;;  %v1787_v45 = vld [vmem:[#allocation3 + $0x8] sm:$0xf] }
 0x1bb   : > { %v1052_v49 = vpop.permute.xlu1 %1051 }
 0x1bc   : > { %v1072_v34 = vsel %vm814_vm1, %v1064_v4, %v1052_v49  ;;  %v1632_v4 = vld [vmem:[#allocation3 + $0x38] sm:$0x1]  ;;  %v1663_v49 = vld [vmem:[#allocation3 + $0x3c] sm:$0x1] }
 0x1bd   : > { %3327 = vmatmul.mubr.msk.bf16.gmra.mrb[4].mxu0 %vm1081_vm3, %v1072_v34  ;;  %v1633_v34 = vsel %vm4073_vm4, 0, %v1632_v4 }
 0x1be   : > { %1634 = vst [vmem:[#allocation3 + $0x38] sm:$0x1] %v1633_v34 }
 0x1bf   : > { %v774_v19 = vpop.permute.xlu0 %773 }
 0x1c0   : > { %v804_v5 = vsel %vm801_vm0, %v3117_v37, %v774_v19  ;;  %v1664_v19 = vsel %vm4598_vm6, 0, %v1663_v49  ;;  %v1627_v37 = vsel %vm4073_vm4, 0, %v1626_v23 }
 0x1c1   : > { %1665 = vst [vmem:[#allocation3 + $0x3c] sm:$0x1] %v1664_v19  ;;  %1628 = vst [vmem:[#allocation3 + $0x28] sm:$0x1] %v1627_v37  ;;  %v1790_v37 = vld [vmem:[#allocation3 + $0xc] sm:$0x1] }
 0x1c2   : > { %v776_v54 = vpop.permute.xlu1 %775 }
 0x1c3   : > { %v794_v38 = vpop.permute.xlu0 %793  ;;  %v807_v61 = vsel %vm801_vm0, %v3118_v46, %v776_v54  ;;  %v1657_v54 = vld [vmem:[#allocation3 + $0x2c] sm:$0x1] }
 0x1c4   : > { %v816_v39 = vsel %vm814_vm1, %v804_v5, %v794_v38  ;;  %v1658_v5 = vsel %vm4598_vm6, 0, %v1657_v54  ;;  %v1635_v38 = vld [vmem:[#allocation3 + $0x40] sm:$0x1] }
 0x1c5   : > { %3332 = vmatprep.mubr.msk.bf16.mxu0 %vm1081_vm3, %v816_v39  ;;  %v1666_v39 = vld [vmem:[#allocation3 + $0x44] sm:$0x1]  ;;  %1659 = vst [vmem:[#allocation3 + $0x2c] sm:$0x1] %v1658_v5 }
 0x1c6   : > { %v796_v24 = vpop.permute.xlu1 %795 }
 0x1c7   : > { %v818_v44 = vsel %vm814_vm1, %v807_v61, %v796_v24  ;;  %v1636_v61 = vsel %vm4073_vm4, 0, %v1635_v38  ;;  %v1667_v24 = vsel %vm4598_vm6, 0, %v1666_v39 }
 0x1c8   : > { %3333 = vmatmul.mubr.msk.bf16.vlgmr.msra.gmra.mrb[0].mxu0 %vm1081_vm3, %v818_v44  ;;  %v1660_v44 = vld [vmem:[#allocation3 + $0x34] sm:$0x1]  ;;  %1637 = vst [vmem:[#allocation3 + $0x40] sm:$0x1] %v1636_v61  ;;  %1668 = vst [vmem:[#allocation3 + $0x44] sm:$0x1] %v1667_v24 }
 0x1c9   : > { %3341 = vmatpush3.bf16.msra.mxu0 %v1505_v43  ;;  %v1629_v43 = vld [vmem:[#allocation3 + $0x30] sm:$0x1]  ;;  %v1805_v24 = vld [vmem:[#allocation3 + $0x20] sm:$0xf] }
 0x1cb   : > { %v778_v16 = vpop.permute.xlu0 %777 }
 0x1cc   : > { %v810_v15 = vsel %vm801_vm0, %v3119_v52, %v778_v16  ;;  %v1630_v16 = vsel %vm4073_vm4, 0, %v1629_v43 }
 0x1cd   : > { %1631 = vst [vmem:[#allocation3 + $0x30] sm:$0x1] %v1630_v16 }
 0x1ce   : > { %v780_v51 = vpop.permute.xlu1 %779 }
 0x1cf   : > { %v798_v55 = vpop.permute.xlu0 %797  ;;  %v813_v30 = vsel %vm801_vm0, %v3120_v7, %v780_v51  ;;  %v3555_v7 = vld [vmem:[#allocation2 + $0x48] sm:$0xf]  ;;  %v1661_v51 = vsel %vm4598_vm6, 0, %v1660_v44 }
 0x1d0   : > { %v820_v12 = vsel %vm814_vm1, %v810_v15, %v798_v55  ;;  %v3170_v52 = vcombine.low %v4485_v17, %v3555_v7  ;;  %1662 = vst [vmem:[#allocation3 + $0x34] sm:$0x1] %v1661_v51  ;;  %v1642_v15 = vld [vmem:[#allocation3 + $0x4] sm:$0x1] }
 0x1d1   : > { %3336 = vmatprep.mubr.msk.bf16.mxu0 %vm1081_vm3, %v820_v12  ;;  %v1643_v55 = vsel %vm4598_vm6, 0, %v1642_v15  ;;  %v1669_v12 = vld [vmem:[#allocation3 + $0x4c] sm:$0x1]  ;;  %v1808_v15 = vld [vmem:[#allocation3 + $0x24] sm:$0x1] }
 0x1d2   : > { %v800_v27 = vpop.permute.xlu1 %799  ;;  %1644 = vst [vmem:[#allocation3 + $0x4] sm:$0x1] %v1643_v55 }
 0x1d3   : > { %v822_v58 = vsel %vm814_vm1, %v813_v30, %v800_v27  ;;  %v1670_v30 = vsel %vm4598_vm6, 0, %v1669_v12  ;;  %v3534_v27 = vld [vmem:[#allocation10 + $0xc] sm:$0xff]  }
 0x1d4   : > { %3337 = vmatmul.mubr.msk.bf16.gmra.mrb[4].mxu0 %vm1081_vm3, %v822_v58  ;;  %1671 = vst [vmem:[#allocation3 + $0x4c] sm:$0x1] %v1670_v30  ;;  %3350 = vmatprep.subr.bf16.mxu1 %v3534_v27  ;;  %v4646_v58 = vld [vmem:[#allocation3] sm:$0xf] }
 0x1d5   : > { %3351 = vmatpush3.bf16.msra.mxu1 %v3534_v27  ;;  %v3193_v63 = vrot.slane %v4646_v58, 9 }
 0x1d8   : > { %v1442_v62 = vpop.permute.xlu0 %1441 }
 0x1d9   : > { %v1471_v47 = vsel %vm801_vm0, %v3167_v48, %v1442_v62  ;;  %v1853_v62 = vshrl.u32 %v4646_v58, 16  ;;  %v4654_v7 = vld [vmem:[#allocation3 + $0x4] sm:$0x1] }
 0x1da   : > { %v1982_v0 = vrot.slane %v4654_v7, 5 }
 0x1db   : > { %v1444_v36 = vpop.permute.xlu1 %1443  ;;  %v4667_v14 = vld [vmem:[#allocation3 + $0x4c] sm:$0x1] }
 0x1dc   : > { %v1462_v60 = vpop.permute.xlu0 %1461  ;;  %v1474_v56 = vsel %vm801_vm0, %v3168_v13, %v1444_v36  ;;  %v1856_v36 = vshll.u32 %v4646_v58, 16  ;;  %v2636_v49 = vshll.u32 %v4667_v14, 16 }
 0x1dd   : > { %v1482_v50 = vsel %vm814_vm1, %v1471_v47, %v1462_v60  ;;  %v4650_v47 = vld [vmem:[#allocation9] ss:$0 sm:$0xff]  ;;  %v1855_v60 = vrot.slane %v1853_v62, 4 }
 0x1de   : > { %3342 = vmatprep.mubr.msk.bf16.mxu0 %vm1081_vm3, %v1482_v50  ;;  %v1858_v50 = vrot.slane %v1856_v36, 5 }
 0x1df   : > { %v1464_v32 = vpop.permute.xlu1 %1463 }
 0x1e0   : > { %v1484_v20 = vsel %vm814_vm1, %v1474_v56, %v1464_v32 }
 0x1e1   : > { %3343 = vmatmul.mubr.msk.bf16.vlgmr.msra.gmra.mrb[0].mxu0 %vm1081_vm3, %v1484_v20 }
 0x1e4   : > { %v1446_v9 = vpop.permute.xlu0 %1445 }
 0x1e5   : > { %v1477_v48 = vsel %vm801_vm0, %v3169_v21, %v1446_v9  ;;  %v1621_v21 = vsel %vm4073_vm4, 0, %v1620_v8 }
 0x1e6   : > { %1622 = vst [vmem:[#allocation3 + $0x18] sm:$0x1] %v1621_v21 }
 0x1e7   : > { %v1448_v46 = vpop.permute.xlu1 %1447 }
 0x1e8   : > { %v1466_v3 = vpop.permute.xlu0 %1465  ;;  %v1480_v53 = vsel %vm801_vm0, %v3170_v52, %v1448_v46  ;;  %v1859_v52 = vor.u32 %v1858_v50, %v1855_v60  ;;  %v1793_v50 = vld [vmem:[#allocation3 + $0x10] sm:$0xf] }
 0x1e9   : > { %v1486_v59 = vsel %vm814_vm1, %v1477_v48, %v1466_v3 }
 0x1ea   : > { %3346 = vmatprep.mubr.msk.bf16.mxu0 %vm1081_vm3, %v1486_v59  ;;  %v4661_v57 = vrot.slane %v1859_v52, 4 }
 0x1eb   : > { %v1468_v13 = vpop.permute.xlu1 %1467 }
 0x1ec   : > { %v1488_v26 = vsel %vm814_vm1, %v1480_v53, %v1468_v13  ;;  %v1862_v53 = vshll.u32 %v4654_v7, 16 }
 0x1ed   : > { %3347 = vmatmul.mubr.msk.bf16.gmra.mrb[4].mxu0 %vm1081_vm3, %v1488_v26  ;;  %v1799_v41 = vld [vmem:[#allocation3 + $0x18] sm:$0xf] }
 0x1ee   : > { %v4664_v25 = vrot.slane %v1862_v53, 5 }
 0x2b4   : > { %v3344_v56 = vpop.f32.mrb[0].mxu0 }
 0x2b5   : > { %v1588_v32 = vadd.f32 %v3344_v56, %v4650_v47  ;;  %v1541_v20 = vpop.f32.mrb[1].mxu0  ;;  %v1796_v56 = vld [vmem:[#allocation3 + $0x14] sm:$0x1] }
 0x2b6   : > { %v1586_v9 = vadd.f32 %v4650_v47, %v1541_v20  ;;  %v3345_v46 = vpop.f32.mrb[2].mxu0 }
 0x2b7   : > { %v1596_v48 = vmax.f32 %v1588_v32, 0.0  ;;  %v1589_v3 = vadd.f32 %v3345_v46, %v4650_v47  ;;  %v1544_v59 = vpop.f32.mrb[3].mxu0 }
 0x2b8   : > { %v1594_v13 = vmax.f32 %v1586_v9, 0.0  ;;  %v1587_v26 = vadd.f32 %v4650_v47, %v1544_v59 }
 0x2b9   : > { %v3280_v17 = vpack.c.bf16 %v1596_v48, %v1596_v48  ;;  %v1597_v8 = vmax.f32 %v1589_v3, 0.0 }
 0x2ba   : > { %v3278_v21 = vpack.c.bf16 %v1594_v13, %v1594_v13  ;;  %v1595_v10 = vmax.f32 %v1587_v26, 0.0 }
 0x2bb   : > { %v1721_v28 = vshrl.u32 %v3280_v17, 16  ;;  %v3281_v31 = vpack.c.bf16 %v1597_v8, %v1597_v8  ;;  %v1724_v42 = vshll.u32 %v3280_v17, 16 }
 0x2bc   : > { %v1705_v6 = vshrl.u32 %v3278_v21, 16  ;;  %v3279_v18 = vpack.c.bf16 %v1595_v10, %v1595_v10  ;;  %v1708_v23 = vshll.u32 %v3278_v21, 16 }
 0x2bd   : > { %v1723_v33 = vrot.slane %v1721_v28, 7  ;;  %v1729_v4 = vshrl.u32 %v3281_v31, 16  ;;  %v1732_v54 = vshll.u32 %v3281_v31, 16  ;;  %v4698_v31 = vrot.slane %v2627_v2, 4  ;;  %v1823_v2 = vld [vmem:[#allocation3 + $0x38] sm:$0xf] }
 0x2be   : > { %v1707_v19 = vrot.slane %v1705_v6, 7  ;;  %v1713_v5 = vshrl.u32 %v3279_v18, 16  ;;  %v1716_v43 = vshll.u32 %v3279_v18, 16 }
 0x2bf   : > { %v1726_v38 = vor.u32 %v1724_v42, %v1723_v33  ;;  %v1727_v39 = vrot.slane %v1723_v33, 4  ;;  %v1731_v61 = vrot.slane %v1729_v4, 7  ;;  %v1865_v42 = vsel %vm4178_vm12, %v4661_v57, %v4664_v25 }
 0x2c0   : > { %v3348_v44 = vpop.f32.mrb[4].mxu0  ;;  %v1710_v16 = vor.u32 %v1708_v23, %v1707_v19  ;;  %v1711_v51 = vrot.slane %v1707_v19, 4  ;;  %v1715_v55 = vrot.slane %v1713_v5, 7  ;;  %v4714_v19 = vrot.slane %v2636_v49, 5 }
 0x2c1   : > { %v1592_v12 = vadd.f32 %v3348_v44, %v4650_v47  ;;  %v1557_v30 = vpop.f32.mrb[5].mxu0  ;;  %v1800_v27 = vsel %vm4674_vm2, %v1726_v38, %v1799_v41  ;;  %v1803_v62 = vsel %vm4073_vm4, %v1727_v39, %v1802_v40  ;;  %v1734_v36 = vor.u32 %v1732_v54, %v1731_v61  ;;  %v1811_v39 = vld [vmem:[#allocation3 + $0x28] sm:$0xf] }
 0x2c2   : > { %v1735_v60 = vrot.slane %v1731_v61, 4  ;;  %v3349_v32 = vpop.f32.mrb[6].mxu0  ;;  %1801 = vst [vmem:[#allocation3 + $0x18] sm:$0xf] %v1800_v27  ;;  %1804 = vst [vmem:[#allocation3 + $0x1c] sm:$0x1] %v1803_v62  ;;  %v1788_v20 = vsel %vm4674_vm2, %v1710_v16, %v1787_v45  ;;  %v1791_v9 = vsel %vm4073_vm4, %v1711_v51, %v1790_v37  ;;  %v1718_v46 = vor.u32 %v1716_v43, %v1715_v55 }
 0x2c3   : > { %v1719_v52 = vrot.slane %v1715_v55, 4  ;;  %v1560_v48 = vpop.f32.mrb[7].mxu0  ;;  %1789 = vst [vmem:[#allocation3 + $0x8] sm:$0xf] %v1788_v20  ;;  %1792 = vst [vmem:[#allocation3 + $0xc] sm:$0x1] %v1791_v9  ;;  %v1806_v3 = vsel %vm4674_vm2, %v1734_v36, %v1805_v24  ;;  %v1590_v13 = vadd.f32 %v4650_v47, %v1557_v30  ;;  %v1593_v8 = vadd.f32 %v3349_v32, %v4650_v47 }
 0x2c4   : > { %v1809_v59 = vsel %vm4073_vm4, %v1735_v60, %v1808_v15  ;;  %v1600_v53 = vmax.f32 %v1592_v12, 0.0  ;;  %1807 = vst [vmem:[#allocation3 + $0x20] sm:$0xf] %v1806_v3  ;;  %v1794_v26 = vsel %vm4674_vm2, %v1718_v46, %v1793_v50  ;;  %v1591_v21 = vadd.f32 %v4650_v47, %v1560_v48  ;;  %v1829_v16 = vld [vmem:[#allocation3 + $0x40] sm:$0xf] }
 0x2c5   : > { %1810 = vst [vmem:[#allocation3 + $0x24] sm:$0x1] %v1809_v59  ;;  %v1797_v17 = vsel %vm4073_vm4, %v1719_v52, %v1796_v56  ;;  %1795 = vst [vmem:[#allocation3 + $0x10] sm:$0xf] %v1794_v26  ;;  %v1598_v28 = vmax.f32 %v1590_v13, 0.0  ;;  %v4700_v41 = vrot.slane %v2630_v11, 5  ;;  %v4712_v47 = vsel %vm4187_vm13, %v3193_v63, %v1982_v0 }
 0x2c6   : > { %1798 = vst [vmem:[#allocation3 + $0x14] sm:$0x1] %v1797_v17  ;;  %v3284_v10 = vpack.c.bf16 %v1600_v53, %v1600_v53  ;;  %v1601_v40 = vmax.f32 %v1593_v8, 0.0  ;;  %v1599_v6 = vmax.f32 %v1591_v21, 0.0  ;;  %v1826_v11 = vld [vmem:[#allocation3 + $0x3c] sm:$0x1] }
 0x2c7   : > { %v3282_v33 = vpack.c.bf16 %v1598_v28, %v1598_v28  ;;  %v3252_v23 = vrot.slane %v4659_v35, 9  ;;  %v2633_v58 = vor.u32 %v4700_v41, %v4698_v31  ;;  %v1814_v63 = vld [vmem:[#allocation3 + $0x2c] sm:$0x1]  ;;  %v1832_v51 = vld [vmem:[#allocation3 + $0x44] sm:$0x1] }
 0x2c8   : > { %v1753_v18 = vshrl.u32 %v3284_v10, 16  ;;  %v3285_v45 = vpack.c.bf16 %v1601_v40, %v1601_v40  ;;  %v3283_v4 = vpack.c.bf16 %v1599_v6, %v1599_v6  ;;  %v1756_v54 = vshll.u32 %v3284_v10, 16  ;;  %v1817_v30 = vld [vmem:[#allocation3 + $0x30] sm:$0xf]  ;;  %v1820_v32 = vld [vmem:[#allocation3 + $0x34] sm:$0x1] }
 0x2c9   : > { %v1737_v5 = vshrl.u32 %v3282_v33, 16  ;;  %v4717_v38 = vld [vmem:[#allocation3 + $0x18] sm:$0xf]  ;;  %v1740_v7 = vshll.u32 %v3282_v33, 16  ;;  %v2093_v20 = vld [vmem:[#allocation3 + $0x1c] sm:$0x1] }
 0x2ca   : > { %v1755_v37 = vrot.slane %v1753_v18, 7  ;;  %v1761_v0 = vshrl.u32 %v3285_v45, 16  ;;  %v1764_v61 = vshll.u32 %v3285_v45, 16  ;;  %v1745_v24 = vshrl.u32 %v3283_v4, 16  ;;  %v4733_v8 = vld [vmem:[#allocation3 + $0x8] sm:$0xf] }
 0x2cb   : > { %v1739_v49 = vrot.slane %v1737_v5, 7  ;;  %v1748_v15 = vshll.u32 %v3283_v4, 16  ;;  %v2133_v27 = vshrl.u32 %v4717_v38, 16  ;;  %v2136_v62 = vshll.u32 %v4717_v38, 16  ;;  %v4727_v3 = vld [vmem:[#allocation3 + $0x20] sm:$0xf] }
 0x2cc   : > { %v1758_v43 = vor.u32 %v1756_v54, %v1755_v37  ;;  %v1759_v44 = vrot.slane %v1755_v37, 4  ;;  %v1763_v55 = vrot.slane %v1761_v0, 7  ;;  %v1747_v12 = vrot.slane %v1745_v24, 7  ;;  %v2095_v59 = vld [vmem:[#allocation3 + $0x24] sm:$0x1] }
 0x2cd   : > { %v1742_v50 = vor.u32 %v1740_v7, %v1739_v49  ;;  %v1743_v56 = vrot.slane %v1739_v49, 4  ;;  %v2135_v26 = vrot.slane %v2133_v27, 4  ;;  %v2138_v17 = vrot.slane %v2136_v62, 5  ;;  %v2089_v21 = vld [vmem:[#allocation3 + $0xc] sm:$0x1] }
 0x2ce   : > { %v1824_v36 = vsel %vm4674_vm2, %v1758_v43, %v1823_v2  ;;  %v1827_v60 = vsel %vm4073_vm4, %v1759_v44, %v1826_v11  ;;  %v1766_v9 = vor.u32 %v1764_v61, %v1763_v55  ;;  %v1767_v46 = vrot.slane %v1763_v55, 4  ;;  %v4745_v4 = vld [vmem:[#allocation3 + $0x10] sm:$0xf] }
 0x2cf   : > { %1825 = vst [vmem:[#allocation3 + $0x38] sm:$0xf] %v1824_v36  ;;  %1828 = vst [vmem:[#allocation3 + $0x3c] sm:$0x1] %v1827_v60  ;;  %v1750_v52 = vor.u32 %v1748_v15, %v1747_v12  ;;  %v1751_v48 = vrot.slane %v1747_v12, 4  ;;  %v1812_v53 = vsel %vm4674_vm2, %v1742_v50, %v1811_v39  ;;  %v1815_v13 = vsel %vm4073_vm4, %v1743_v56, %v1814_v63 }
 0x2d0   : > { %1813 = vst [vmem:[#allocation3 + $0x28] sm:$0xf] %v1812_v53  ;;  %1816 = vst [vmem:[#allocation3 + $0x2c] sm:$0x1] %v1815_v13  ;;  %v1830_v10 = vsel %vm4674_vm2, %v1766_v9, %v1829_v16  ;;  %v1833_v28 = vsel %vm4073_vm4, %v1767_v46, %v1832_v51  ;;  %v2139_v18 = vor.u32 %v2138_v17, %v2135_v26  ;;  %v2142_v33 = vshll.u32 %v2093_v20, 16 }
 0x2d1   : > { %v1818_v40 = vsel %vm4674_vm2, %v1750_v52, %v1817_v30  ;;  %v1821_v6 = vsel %vm4073_vm4, %v1751_v48, %v1820_v32  ;;  %1831 = vst [vmem:[#allocation3 + $0x40] sm:$0xf] %v1830_v10  ;;  %1834 = vst [vmem:[#allocation3 + $0x44] sm:$0x1] %v1833_v28  ;;  %v2147_v2 = vshrl.u32 %v4727_v3, 16  ;;  %v2150_v11 = vshll.u32 %v4727_v3, 16 }
 0x2d2   : > { %1819 = vst [vmem:[#allocation3 + $0x30] sm:$0xf] %v1818_v40  ;;  %1822 = vst [vmem:[#allocation3 + $0x34] sm:$0x1] %v1821_v6  ;;  %v2156_v45 = vshll.u32 %v2095_v59, 16  ;;  %v2105_v37 = vshrl.u32 %v4733_v8, 16 }
 0x2d3   : > { %v2108_v34 = vshll.u32 %v4733_v8, 16  ;;  %v2114_v54 = vshll.u32 %v2089_v21, 16  ;;  %v2140_v1 = vrot.slane %v2139_v18, 4  ;;  %v2144_v5 = vrot.slane %v2142_v33, 5  ;;  %v2091_v63 = vld [vmem:[#allocation3 + $0x14] sm:$0x1] }
 0x2d4   : > { %v2149_v7 = vrot.slane %v2147_v2, 4  ;;  %v2152_v39 = vrot.slane %v2150_v11, 5  ;;  %v2158_v0 = vrot.slane %v2156_v45, 5  ;;  %v2107_v61 = vrot.slane %v2105_v37, 4 }
 0x2d5   : > { %v2110_v24 = vrot.slane %v2108_v34, 5  ;;  %v2116_v43 = vrot.slane %v2114_v54, 5  ;;  %v2145_v44 = vsel %vm4178_vm12, %v2140_v1, %v2144_v5  ;;  %v2119_v16 = vshrl.u32 %v4745_v4, 16 }
 0x2d6   : > { %v2153_v49 = vor.u32 %v2152_v39, %v2149_v7  ;;  %v2122_v51 = vshll.u32 %v4745_v4, 16  ;;  %v2128_v55 = vshll.u32 %v2091_v63, 16  ;;  %v3215_v12 = vrot.slane %v4717_v38, 9  ;;  %v4757_v46 = vld [vmem:[#allocation3 + $0x38] sm:$0xf] }
 0x2d7   : > { %v2111_v15 = vor.u32 %v2110_v24, %v2107_v61  ;;  %v2242_v30 = vrot.slane %v2093_v20, 5  ;;  %v2121_v62 = vrot.slane %v2119_v16, 4  ;;  %v3216_v60 = vrot.slane %v4727_v3, 9  ;;  %v4762_v13 = vld [vmem:[#allocation3 + $0x3c] sm:$0x1] }
 0x2d8   : > { %v2154_v27 = vrot.slane %v2153_v49, 4  ;;  %v2124_v36 = vrot.slane %v2122_v51, 5  ;;  %v2130_v56 = vrot.slane %v2128_v55, 5  ;;  %v2246_v9 = vrot.slane %v2095_v59, 5  ;;  %v4764_v26 = vld [vmem:[#allocation3 + $0x40] sm:$0xf] }
 0x2d9   : > { %v2112_v50 = vrot.slane %v2111_v15, 4  ;;  %v2243_v32 = vsel %vm4187_vm13, %v3215_v12, %v2242_v30  ;;  %v3213_v53 = vrot.slane %v4733_v8, 9  ;;  %v2234_v20 = vrot.slane %v2089_v21, 5  ;;  %v4771_v40 = vld [vmem:[#allocation3 + $0x44] sm:$0x1] }
 0x2da   : > { %v2159_v52 = vsel %vm4178_vm12, %v2154_v27, %v2158_v0  ;;  %v2125_v48 = vor.u32 %v2124_v36, %v2121_v62  ;;  %v2247_v59 = vsel %vm4187_vm13, %v3216_v60, %v2246_v9  ;;  %v3214_v28 = vrot.slane %v4745_v4, 9  ;;  %v4786_v7 = vld [vmem:[#allocation3 + $0x28] sm:$0xf]  ;;  %v2097_v39 = vld [vmem:[#allocation3 + $0x2c] sm:$0x1] }
 0x2db   : > { %v3226_v17 = vcombine.low %v2145_v44, %v2159_v52  ;;  %v2117_v10 = vsel %vm4178_vm12, %v2112_v50, %v2116_v43  ;;  %v3230_v18 = vcombine.low %v2243_v32, %v2247_v59  ;;  %v2235_v21 = vsel %vm4187_vm13, %v3213_v53, %v2234_v20  ;;  %v4788_v43 = vld [vmem:[#allocation3 + $0x30] sm:$0xf]  ;;  %v2099_v44 = vld [vmem:[#allocation3 + $0x34] sm:$0x1] }
 0x2dc   : > { %v2126_v6 = vrot.slane %v2125_v48, 4  ;;  %v2238_v33 = vrot.slane %v2091_v63, 5  ;;  %v2189_v2 = vshrl.u32 %v4757_v46, 16  ;;  %v2192_v11 = vshll.u32 %v4757_v46, 16 }
 0x2dd   : > { %2290 = vrot.lane.b32.xlu1 %v3226_v17, %s3786_s23  ;;  %v2198_v45 = vshll.u32 %v4762_v13, 16  ;;  %v2203_v37 = vshrl.u32 %v4764_v26, 16  ;;  %v2206_v1 = vshll.u32 %v4764_v26, 16  ;;  %v2212_v5 = vshll.u32 %v4771_v40, 16 }
 0x2de   : > { %v2131_v34 = vsel %vm4178_vm12, %v2126_v6, %v2130_v56  ;;  %v2239_v54 = vsel %vm4187_vm13, %v3214_v28, %v2238_v33  ;;  %v2191_v61 = vrot.slane %v2189_v2, 4  ;;  %v2194_v24 = vrot.slane %v2192_v11, 5  ;;  %v4805_v11 = vld [vmem:[#allocation3 + $0x10] sm:$0xf] }
 0x2df   : > { %v3225_v63 = vcombine.low %v2117_v10, %v2131_v34  ;;  %v3229_v0 = vcombine.low %v2235_v21, %v2239_v54  ;;  %v2200_v49 = vrot.slane %v2198_v45, 5  ;;  %v2205_v16 = vrot.slane %v2203_v37, 4 }
 0x2e0   : > { %v2208_v51 = vrot.slane %v2206_v1, 5  ;;  %v2214_v15 = vrot.slane %v2212_v5, 5  ;;  %v2195_v55 = vor.u32 %v2194_v24, %v2191_v61  ;;  %v2161_v12 = vshrl.u32 %v4786_v7, 16  ;;  %v1841_v1 = vld [vmem:[#allocation3 + $0x14] sm:$0x1] }
 0x2e1   : > { %2288 = vrot.lane.b32.xlu0 %v3225_v63, %s3786_s23  ;;  %2310 = vrot.lane.b32.xlu1 %v3230_v18, %s3787_s27  ;;  %v2164_v30 = vshll.u32 %v4786_v7, 16  ;;  %v2170_v27 = vshll.u32 %v2097_v39, 16  ;;  %v2175_v36 = vshrl.u32 %v4788_v43, 16  ;;  %v2178_v60 = vshll.u32 %v4788_v43, 16  ;;  %v4813_v61 = vld [vmem:[#allocation3 + $0x18] sm:$0xf] }
 0x2e2   : > { %v2209_v62 = vor.u32 %v2208_v51, %v2205_v16  ;;  %v2184_v50 = vshll.u32 %v2099_v44, 16  ;;  %v2196_v56 = vrot.slane %v2195_v55, 4  ;;  %v2163_v32 = vrot.slane %v2161_v12, 4 }
 0x2e3   : > { %v2166_v9 = vrot.slane %v2164_v30, 5  ;;  %v2172_v52 = vrot.slane %v2170_v27, 5  ;;  %v2177_v53 = vrot.slane %v2175_v36, 4  ;;  %v2180_v20 = vrot.slane %v2178_v60, 5  ;;  %v4824_v30 = vld [vmem:[#allocation3 + $0x8] sm:$0xf] }
 0x2e4   : > { %v2210_v48 = vrot.slane %v2209_v62, 4  ;;  %v2186_v17 = vrot.slane %v2184_v50, 5  ;;  %v2201_v10 = vsel %vm4178_vm12, %v2196_v56, %v2200_v49  ;;  %v3219_v28 = vrot.slane %v4757_v46, 9 }
 0x2e5   : > { %2308 = vrot.lane.b32.xlu0 %v3229_v0, %s3787_s27  ;;  %v2167_v59 = vor.u32 %v2166_v9, %v2163_v32  ;;  %v2258_v6 = vrot.slane %v4762_v13, 5  ;;  %v2181_v21 = vor.u32 %v2180_v20, %v2177_v53  ;;  %v3220_v33 = vrot.slane %v4764_v26, 9  ;;  %v1839_v32 = vld [vmem:[#allocation3 + $0xc] sm:$0x1] }
 0x2e6   : > { %v2215_v18 = vsel %vm4178_vm12, %v2210_v48, %v2214_v15  ;;  %v2262_v2 = vrot.slane %v4771_v40, 5  ;;  %v3217_v54 = vrot.slane %v4786_v7, 9  ;;  %v2250_v63 = vrot.slane %v2097_v39, 5  ;;  %v1843_v39 = vld [vmem:[#allocation3 + $0x1c] sm:$0x1] }
 0x2e7   : > { %v3228_v45 = vcombine.low %v2201_v10, %v2215_v18  ;;  %v2168_v37 = vrot.slane %v2167_v59, 4  ;;  %v2259_v34 = vsel %vm4187_vm13, %v3219_v28, %v2258_v6  ;;  %v2182_v5 = vrot.slane %v2181_v21, 4 }
 0x2e8   : > { %v2263_v13 = vsel %vm4187_vm13, %v3220_v33, %v2262_v2  ;;  %v3218_v0 = vrot.slane %v4788_v43, 9  ;;  %v2254_v49 = vrot.slane %v2099_v44, 5  ;;  %v1881_v16 = vshrl.u32 %v4805_v11, 16 }
 0x2e9   : > { %2294 = vrot.lane.b32.xlu1 %v3228_v45, %s3786_s23  ;;  %v2173_v40 = vsel %vm4178_vm12, %v2168_v37, %v2172_v52  ;;  %v3232_v24 = vcombine.low %v2259_v34, %v2263_v13  ;;  %v2187_v51 = vsel %vm4178_vm12, %v2182_v5, %v2186_v17  ;;  %v2251_v15 = vsel %vm4187_vm13, %v3217_v54, %v2250_v63  ;;  %v4847_v13 = vld [vmem:[#allocation3 + $0x34] sm:$0x1] }
 0x2ea   : > { %v1884_v55 = vshll.u32 %v4805_v11, 16  ;;  %v1890_v12 = vshll.u32 %v1841_v1, 16  ;;  %v3227_v27 = vcombine.low %v2173_v40, %v2187_v51  ;;  %v2255_v62 = vsel %vm4187_vm13, %v3218_v0, %v2254_v49  ;;  %v4854_v51 = vld [vmem:[#allocation3 + $0x38] sm:$0xf] }
 0x2eb   : > { %v1883_v36 = vrot.slane %v1881_v16, 4  ;;  %v1895_v44 = vshrl.u32 %v4813_v61, 16  ;;  %v3231_v60 = vcombine.low %v2251_v15, %v2255_v62  ;;  %v1898_v56 = vshll.u32 %v4813_v61, 16 }
 0x2ec   : > { %v1886_v50 = vrot.slane %v1884_v55, 5  ;;  %v4833_v9 = vrot.slane %v2633_v58, 4  ;;  %2292 = vrot.lane.b32.xlu0 %v3227_v27, %s3786_s23  ;;  %v1904_v48 = vshll.u32 %v1843_v39, 16  ;;  %v1867_v53 = vshrl.u32 %v4824_v30, 16  ;;  %v4840_v58 = vld [vmem:[#allocation3 + $0x30] sm:$0xf] }
 0x2ed   : > { %2314 = vrot.lane.b32.xlu1 %v3232_v24, %s3787_s27  ;;  %v1897_v52 = vrot.slane %v1895_v44, 4  ;;  %v1870_v20 = vshll.u32 %v4824_v30, 16  ;;  %v1892_v10 = vrot.slane %v1890_v12, 5  ;;  %v1900_v59 = vrot.slane %v1898_v56, 5  ;;  %v1851_v12 = vld [vmem:[#allocation3 + $0x3c] sm:$0x1] }
 0x2ee   : > { %v1887_v17 = vor.u32 %v1886_v50, %v1883_v36  ;;  %v3195_v28 = vrot.slane %v4805_v11, 9  ;;  %v1869_v6 = vrot.slane %v1867_v53, 4  ;;  %v1876_v31 = vshll.u32 %v1839_v32, 16  ;;  %v4862_v36 = vld [vmem:[#allocation3 + $0x20] sm:$0xf] }
 0x2ef   : > { %v1872_v18 = vrot.slane %v1870_v20, 5  ;;  %v1990_v41 = vrot.slane %v1841_v1, 5  ;;  %v1901_v33 = vor.u32 %v1900_v59, %v1897_v52  ;;  %v1906_v2 = vrot.slane %v1904_v48, 5 }
 0x2f0   : > { %v1888_v21 = vrot.slane %v1887_v17, 4  ;;  %v3196_v45 = vrot.slane %v4813_v61, 9  ;;  %2312 = vrot.lane.b32.xlu0 %v3231_v60, %s3787_s27  ;;  %v1994_v54 = vrot.slane %v1843_v39, 5  ;;  %v3194_v5 = vrot.slane %v4824_v30, 9  ;;  %v4876_v17 = vld [vmem:[#allocation3 + $0x24] sm:$0x1] }
 0x2f1   : > { %v1873_v37 = vor.u32 %v1872_v18, %v1869_v6  ;;  %v1991_v34 = vsel %vm4187_vm13, %v3195_v28, %v1990_v41  ;;  %v1902_v63 = vrot.slane %v1901_v33, 4  ;;  %v1986_v0 = vrot.slane %v1839_v32, 5  ;;  %v4866_v32 = vld [vmem:[#allocation3 + $0x28] sm:$0xf] }
 0x2f2   : > { %v1893_v1 = vsel %vm4178_vm12, %v1888_v21, %v1892_v10  ;;  %v1937_v40 = vshrl.u32 %v4840_v58, 16  ;;  %v1878_v49 = vrot.slane %v1876_v31, 5  ;;  %v1995_v16 = vsel %vm4187_vm13, %v3196_v45, %v1994_v54 }
 0x2f3   : > { %v1874_v24 = vrot.slane %v1873_v37, 4  ;;  %v1940_v15 = vshll.u32 %v4840_v58, 16  ;;  %v1907_v39 = vsel %vm4178_vm12, %v1902_v63, %v1906_v2  ;;  %v1987_v55 = vsel %vm4187_vm13, %v3194_v5, %v1986_v0 }
 0x2f4   : > { %v1939_v27 = vrot.slane %v1937_v40, 4  ;;  %v1946_v62 = vshll.u32 %v4847_v13, 16  ;;  %v3206_v44 = vcombine.low %v1893_v1, %v1907_v39  ;;  %v3210_v50 = vcombine.low %v1991_v34, %v1995_v16 }
 0x2f5   : > { %v1879_v60 = vsel %vm4178_vm12, %v1874_v24, %v1878_v49  ;;  %v1942_v56 = vrot.slane %v1940_v15, 5  ;;  %v3209_v48 = vcombine.low %v4712_v47, %v1987_v55  ;;  %v1951_v53 = vshrl.u32 %v4854_v51, 16  ;;  %v1847_v47 = vld [vmem:[#allocation3 + $0x2c] sm:$0x1] }
 0x2f6   : > { %v3205_v52 = vcombine.low %v1865_v42, %v1879_v60  ;;  %v1954_v20 = vshll.u32 %v4854_v51, 16  ;;  %2038 = vrot.lane.b32.xlu1 %v3206_v44, %s3786_s23  ;;  %v1960_v59 = vshll.u32 %v1851_v12, 16  ;;  %v1909_v28 = vshrl.u32 %v4862_v36, 16 }
 0x2f7   : > { %v1943_v10 = vor.u32 %v1942_v56, %v1939_v27  ;;  %v1912_v6 = vshll.u32 %v4862_v36, 16  ;;  %v1948_v57 = vrot.slane %v1946_v62, 5  ;;  %v1953_v25 = vrot.slane %v1951_v53, 4  ;;  %v4892_v27 = vld [vmem:[#allocation3 + $0x20] sm:$0xf] }
 0x2f8   : > { %2036 = vrot.lane.b32.xlu0 %v3205_v52, %s3786_s23  ;;  %v1956_v42 = vrot.slane %v1954_v20, 5  ;;  %v1923_v18 = vshrl.u32 %v4866_v32, 16  ;;  %v1911_v41 = vrot.slane %v1909_v28, 4  ;;  %v1918_v33 = vshll.u32 %v4876_v17, 16  ;;  %v4899_v56 = vld [vmem:[#allocation3 + $0x24] sm:$0x1] }
 0x2f9   : > { %v1944_v31 = vrot.slane %v1943_v10, 4  ;;  %v1914_v21 = vrot.slane %v1912_v6, 5  ;;  %v1962_v45 = vrot.slane %v1960_v59, 5  ;;  %v1926_v34 = vshll.u32 %v4866_v32, 16  ;;  %v2519_v20 = vld [vmem:[#allocation3 + $0x2c] sm:$0x1] }
 0x2fa   : > { %v1957_v2 = vor.u32 %v1956_v42, %v1953_v25  ;;  %v1925_v37 = vrot.slane %v1923_v18, 4  ;;  %2058 = vrot.lane.b32.xlu1 %v3210_v50, %s3787_s27  ;;  %v1932_v1 = vshll.u32 %v1847_v47, 16  ;;  %v3199_v63 = vrot.slane %v4840_v58, 9 }
 0x2fb   : > { %v1949_v54 = vsel %vm4178_vm12, %v1944_v31, %v1948_v57  ;;  %v1915_v5 = vor.u32 %v1914_v21, %v1911_v41  ;;  %v1928_v40 = vrot.slane %v1926_v34, 5  ;;  %v2006_v24 = vrot.slane %v4847_v13, 5  ;;  %v4901_v13 = vld [vmem:[#allocation3 + $0x28] sm:$0xf] }
 0x2fc   : > { %2056 = vrot.lane.b32.xlu0 %v3209_v48, %s3787_s27  ;;  %v1958_v0 = vrot.slane %v1957_v2, 4  ;;  %v3200_v49 = vrot.slane %v4854_v51, 9  ;;  %v1920_v15 = vrot.slane %v1918_v33, 5  ;;  %v1934_v39 = vrot.slane %v1932_v1, 5  ;;  %v4921_v33 = vld [vmem:[#allocation3 + $0x14] sm:$0x1] }
 0x2fd   : > { %v1916_v16 = vrot.slane %v1915_v5, 4  ;;  %v2010_v55 = vrot.slane %v1851_v12, 5  ;;  %v1929_v44 = vor.u32 %v1928_v40, %v1925_v37  ;;  %v2007_v60 = vsel %vm4187_vm13, %v3199_v63, %v2006_v24  ;;  %v4927_v40 = vld [vmem:[#allocation3 + $0x1c] sm:$0x1] }
 0x2fe   : > { %v1963_v62 = vsel %vm4178_vm12, %v1958_v0, %v1962_v45  ;;  %v3197_v50 = vrot.slane %v4862_v36, 9  ;;  %v1998_v12 = vrot.slane %v4876_v17, 5  ;;  %v3198_v53 = vrot.slane %v4866_v32, 9 }
 0x2ff   : > { %v3208_v52 = vcombine.low %v1949_v54, %v1963_v62  ;;  %v2011_v48 = vsel %vm4187_vm13, %v3200_v49, %v2010_v55  ;;  %v1921_v10 = vsel %vm4178_vm12, %v1916_v16, %v1920_v15  ;;  %v1930_v59 = vrot.slane %v1929_v44, 4  ;;  %v4925_v54 = vld [vmem:[#allocation3 + $0x18] sm:$0xf] }
 0x300   : > { %v3212_v28 = vcombine.low %v2007_v60, %v2011_v48  ;;  %v2002_v6 = vrot.slane %v1847_v47, 5  ;;  %v2557_v57 = vshrl.u32 %v4892_v27, 16  ;;  %v2560_v25 = vshll.u32 %v4892_v27, 16  ;;  %v4919_v47 = vld [vmem:[#allocation3 + $0x10] sm:$0xf] }
 0x301   : > { %2042 = vrot.lane.b32.xlu1 %v3208_v52, %s3786_s23  ;;  %v2566_v42 = vshll.u32 %v4899_v56, 16  ;;  %v2571_v18 = vshrl.u32 %v4901_v13, 16  ;;  %v1935_v17 = vsel %vm4178_vm12, %v1930_v59, %v1934_v39  ;;  %v2574_v41 = vshll.u32 %v4901_v13, 16 }
 0x302   : > { %v2003_v31 = vsel %vm4187_vm13, %v3198_v53, %v2002_v6  ;;  %v2580_v21 = vshll.u32 %v2519_v20, 16  ;;  %v3207_v2 = vcombine.low %v1921_v10, %v1935_v17  ;;  %v1999_v45 = vsel %vm4187_vm13, %v3197_v50, %v1998_v12 }
 0x303   : > { %v2559_v37 = vrot.slane %v2557_v57, 4  ;;  %v2562_v34 = vrot.slane %v2560_v25, 5  ;;  %v3211_v5 = vcombine.low %v1999_v45, %v2003_v31  ;;  %v2568_v1 = vrot.slane %v2566_v42, 5 }
 0x304   : > { %v2573_v63 = vrot.slane %v2571_v18, 4  ;;  %v2576_v0 = vrot.slane %v2574_v41, 5  ;;  %2040 = vrot.lane.b32.xlu0 %v3207_v2, %s3786_s23  ;;  %v2529_v49 = vshrl.u32 %v4919_v47, 16  ;;  %v2532_v16 = vshll.u32 %v4919_v47, 16  ;;  %v4945_v41 = vld [vmem:[#allocation3 + $0x40] sm:$0xf] }
 0x305   : > { %2062 = vrot.lane.b32.xlu1 %v3212_v28, %s3787_s27  ;;  %v2563_v24 = vor.u32 %v2562_v34, %v2559_v37  ;;  %v2538_v15 = vshll.u32 %v4921_v33, 16  ;;  %v2582_v55 = vrot.slane %v2580_v21, 5  ;;  %v2543_v62 = vshrl.u32 %v4925_v54, 16  ;;  %v2525_v34 = vld [vmem:[#allocation3 + $0x44] sm:$0x1] }
 0x306   : > { %v2577_v39 = vor.u32 %v2576_v0, %v2573_v63  ;;  %v2546_v44 = vshll.u32 %v4925_v54, 16  ;;  %v2531_v50 = vrot.slane %v2529_v49, 4  ;;  %v2534_v52 = vrot.slane %v2532_v16, 5  ;;  %v4953_v0 = vld [vmem:[#allocation3 + $0x30] sm:$0xf] }
 0x307   : > { %v2564_v60 = vrot.slane %v2563_v24, 4  ;;  %v2552_v48 = vshll.u32 %v4927_v40, 16  ;;  %v2540_v53 = vrot.slane %v2538_v15, 5  ;;  %v2545_v10 = vrot.slane %v2543_v62, 4  ;;  %v4964_v62 = vld [vmem:[#allocation3 + $0x38] sm:$0xf] }
 0x308   : > { %v2578_v12 = vrot.slane %v2577_v39, 4  ;;  %v2548_v59 = vrot.slane %v2546_v44, 5  ;;  %2060 = vrot.lane.b32.xlu0 %v3211_v5, %s3787_s27  ;;  %v2535_v6 = vor.u32 %v2534_v52, %v2531_v50  ;;  %v3247_v57 = vrot.slane %v4892_v27, 9 }
 0x309   : > { %v2569_v28 = vsel %vm4178_vm12, %v2564_v60, %v2568_v1  ;;  %v2666_v25 = vrot.slane %v4899_v56, 5  ;;  %v3248_v17 = vrot.slane %v4901_v13, 9  ;;  %v2670_v31 = vrot.slane %v2519_v20, 5 }
 0x30a   : > { %v2583_v42 = vsel %vm4178_vm12, %v2578_v12, %v2582_v55  ;;  %v2549_v18 = vor.u32 %v2548_v59, %v2545_v10  ;;  %v2536_v2 = vrot.slane %v2535_v6, 4  ;;  %v2554_v45 = vrot.slane %v2552_v48, 5  ;;  %v2523_v48 = vld [vmem:[#allocation3 + $0x3c] sm:$0x1] }
 0x30b   : > { %v3258_v21 = vcombine.low %v2569_v28, %v2583_v42  ;;  %v2667_v37 = vsel %vm4187_vm13, %v3247_v57, %v2666_v25  ;;  %v2671_v56 = vsel %vm4187_vm13, %v3248_v17, %v2670_v31  ;;  %v3245_v1 = vrot.slane %v4919_v47, 9 }
 0x30c   : > { %v2550_v5 = vrot.slane %v2549_v18, 4  ;;  %v2658_v63 = vrot.slane %v4921_v33, 5  ;;  %v2541_v20 = vsel %vm4178_vm12, %v2536_v2, %v2540_v53  ;;  %v3246_v24 = vrot.slane %v4925_v54, 9  ;;  %v2521_v33 = vld [vmem:[#allocation3 + $0x34] sm:$0x1] }
 0x30d   : > { %2714 = vrot.lane.b32.xlu1 %v3258_v21, %s3786_s23  ;;  %v2662_v49 = vrot.slane %v4927_v40, 5  ;;  %v2613_v16 = vshrl.u32 %v4945_v41, 16  ;;  %v3262_v39 = vcombine.low %v2667_v37, %v2671_v56  ;;  %v2616_v55 = vshll.u32 %v4945_v41, 16 }
 0x30e   : > { %v2555_v15 = vsel %vm4178_vm12, %v2550_v5, %v2554_v45  ;;  %v2686_v44 = vrot.slane %v4667_v14, 5  ;;  %v2622_v52 = vshll.u32 %v2525_v34, 16  ;;  %v2585_v12 = vshrl.u32 %v4953_v0, 16 }
 0x30f   : > { %v3257_v60 = vcombine.low %v2541_v20, %v2555_v15  ;;  %v2615_v50 = vrot.slane %v2613_v16, 4  ;;  %v2659_v40 = vsel %vm4187_vm13, %v3245_v1, %v2658_v63  ;;  %v2618_v53 = vrot.slane %v2616_v55, 5  ;;  %v3537_v1 = vld [vmem:[#allocation10 + $0x14] ss:$0 sps:$4 sm:$0xff]  }
 0x310   : > { %v2639_v10 = vsel %vm4178_vm12, %v4833_v9, %v4714_v19  ;;  %v2588_v59 = vshll.u32 %v4953_v0, 16  ;;  %v2663_v14 = vsel %vm4187_vm13, %v3246_v24, %v2662_v49  ;;  %v2587_v28 = vrot.slane %v2585_v12, 4 }
 0x311   : > { %2712 = vrot.lane.b32.xlu0 %v3257_v60, %s3786_s23  ;;  %2734 = vrot.lane.b32.xlu1 %v3262_v39, %s3787_s27  ;;  %v2599_v6 = vshrl.u32 %v4964_v62, 16  ;;  %v2602_v57 = vshll.u32 %v4964_v62, 16  ;;  %v2619_v25 = vor.u32 %v2618_v53, %v2615_v50  ;;  %v2594_v18 = vshll.u32 %v2521_v33, 16  ;;  %v3538_v60 = vld [vmem:[#allocation10] sm:$0xff]  }
 0x312   : > { %v2590_v42 = vrot.slane %v2588_v59, 5  ;;  %v2608_v17 = vshll.u32 %v2523_v48, 16  ;;  %v3261_v31 = vcombine.low %v2659_v40, %v2663_v14  ;;  %v2624_v19 = vrot.slane %v2622_v52, 5 }
 0x313   : > { %v2601_v9 = vrot.slane %v2599_v6, 4  ;;  %v2604_v21 = vrot.slane %v2602_v57, 5  ;;  %v2620_v2 = vrot.slane %v2619_v25, 4  ;;  %v3251_v37 = vrot.slane %v4945_v41, 9 }
 0x314   : > { %v2591_v45 = vor.u32 %v2590_v42, %v2587_v28  ;;  %v2682_v5 = vrot.slane %v2525_v34, 5  ;;  %v2596_v24 = vrot.slane %v2594_v18, 5  ;;  %v2610_v49 = vrot.slane %v2608_v17, 5  ;;  %v3541_v18 = vld [vmem:[#allocation10 + $0x8] ss:$0 sps:$4 sm:$0xff]  }
 0x315   : > { %2732 = vrot.lane.b32.xlu0 %v3261_v31, %s3787_s27  ;;  %v2605_v56 = vor.u32 %v2604_v21, %v2601_v9  ;;  %v2625_v63 = vsel %vm4178_vm12, %v2620_v2, %v2624_v19  ;;  %v3249_v39 = vrot.slane %v4953_v0, 9  ;;  %v2674_v55 = vrot.slane %v2521_v33, 5 }
 0x316   : > { %v2592_v20 = vrot.slane %v2591_v45, 4  ;;  %v3260_v16 = vcombine.low %v2625_v63, %v2639_v10  ;;  %v2683_v34 = vsel %vm4187_vm13, %v3251_v37, %v2682_v5  ;;  %v2687_v52 = vsel %vm4187_vm13, %v3252_v23, %v2686_v44 }
 0x317   : > { %v2606_v15 = vrot.slane %v2605_v56, 4  ;;  %vm2357_vm4 = vcmask 1043456   ;;  %v3250_v33 = vrot.slane %v4964_v62, 9  ;;  %v2678_v40 = vrot.slane %v2523_v48, 5  ;;  %v3556_v56 = vld [vmem:[#allocation3] sm:$0xf] }
 0x318   : > { %v2597_v50 = vsel %vm4178_vm12, %v2592_v20, %v2596_v24  ;;  %2718 = vrot.lane.b32.xlu1 %v3260_v16, %s3786_s23  ;;  %3421 = vmatprep.subr.msk.bf16.mxu1 %vm2357_vm4, %v3537_v1  ;;  %v2359_v53 = vsel %vm2357_vm4, %v3537_v1, 0  ;;  %v3224_v35 = vcombine.low %v4757_v46, %v4764_v26  ;;  %v3223_v23 = vcombine.low %v4786_v7, %v4788_v43 }
 0x319   : > { %v2611_v12 = vsel %vm4178_vm12, %v2606_v15, %v2610_v49  ;;  %3353 = vmatpush3.bf16.msra.mxu1 %v2359_v53  ;;  %v3264_v44 = vcombine.low %v2683_v34, %v2687_v52  ;;  %v2675_v22 = vsel %vm4187_vm13, %v3249_v39, %v2674_v55  ;;  %v3202_v48 = vcombine.low %v4805_v11, %v4813_v61  ;;  %v3547_v15 = vld [vmem:[#allocation10 + $0x20] ss:$0 sps:$4 sm:$0xff]  }
 0x31a   : > { %v3259_v10 = vcombine.low %v2597_v50, %v2611_v12  ;;  %3362 = vmatprep.subr.bf16.mxu1 %v3538_v60  ;;  %v3204_v59 = vcombine.low %v4840_v58, %v4854_v51  ;;  %v3203_v14 = vcombine.low %v4862_v36, %v4866_v32  ;;  %v3254_v46 = vcombine.low %v4892_v27, %v4901_v13 }
 0x31b   : > { %v3253_v26 = vcombine.low %v4919_v47, %v4925_v54  ;;  %v2679_v7 = vsel %vm4187_vm13, %v3250_v33, %v2678_v40  ;;  %v3255_v43 = vcombine.low %v4953_v0, %v4964_v62  ;;  %v3221_v36 = vcombine.low %v4733_v8, %v4745_v4 }
 0x31c   : > { %2716 = vrot.lane.b32.xlu0 %v3259_v10, %s3786_s23  ;;  %2738 = vrot.lane.b32.xlu1 %v3264_v44, %s3787_s27  ;;  %v3263_v11 = vcombine.low %v2675_v22, %v2679_v7  ;;  %v3222_v32 = vcombine.low %v4717_v38, %v4727_v3  ;;  %v2444_v38 = vsel %vm2357_vm4, %v3541_v18, 0  ;;  %v3544_v3 = vld [vmem:[#allocation10 + $0x18] sm:$0xff]   ;;  %v3201_v1 = vcombine.low %v3556_v56, %v4824_v30 }
 0x31d   : > { %v2781_v30 = vsel %vm2357_vm4, %v3547_v15, 0 }
 0x320   : > { %2736 = vrot.lane.b32.xlu0 %v3263_v11, %s3787_s27  ;;  %v3271_v11 = vld [vmem:[#allocation12] ss:$0 sm:$0xff] }
 0x34f   : > { %v2291_v61 = vpop.permute.xlu1 %2290 }
 0x350   : > { %v2321_v25 = vsel %vm814_vm1, %v3222_v32, %v2291_v61 }
 0x353   : > { %v2289_v28 = vpop.permute.xlu0 %2288  ;;  %v2311_v6 = vpop.permute.xlu1 %2310 }
 0x354   : > { %v2318_v29 = vsel %vm814_vm1, %v3221_v36, %v2289_v28  ;;  %v2331_v17 = vsel %vm2076_vm5, %v2321_v25, %v2311_v6 }
 0x357   : > { %v2309_v57 = vpop.permute.xlu0 %2308 }
 0x358   : > { %v2329_v42 = vsel %vm2076_vm5, %v2318_v29, %v2309_v57 }
 0x359   : > { %3354 = vmatprep.mubr.msk.bf16.mxu1 %vm2348_vm8, %v2329_v42 }
 0x35a   : > { %3355 = vmatmul.mubr.msk.bf16.vlgmr.msra.gmra.mrb[0].mxu1 %vm2348_vm8, %v2331_v17 }
 0x35b   : > { %3363 = vmatpush3.bf16.msra.mxu1 %v3538_v60  ;;  %v2295_v8 = vpop.permute.xlu1 %2294 }
 0x35c   : > { %3422 = vmatprep.subr.msk.bf16.mxu1 %vm2357_vm4, %v3541_v18  ;;  %v2327_v21 = vsel %vm814_vm1, %v3224_v35, %v2295_v8 }
 0x35e   : > { %v2293_v4 = vpop.permute.xlu0 %2292 }
 0x35f   : > { %3365 = vmatpush3.bf16.msra.mxu1 %v2444_v38  ;;  %v2315_v31 = vpop.permute.xlu1 %2314  ;;  %v2324_v19 = vsel %vm814_vm1, %v3223_v23, %v2293_v4 }
 0x360   : > { %3374 = vmatprep.subr.bf16.mxu1 %v3544_v3  ;;  %v2335_v45 = vsel %vm2076_vm5, %v2327_v21, %v2315_v31 }
 0x362   : > { %v2313_v9 = vpop.permute.xlu0 %2312 }
 0x363   : > { %v2333_v2 = vsel %vm2076_vm5, %v2324_v19, %v2313_v9 }
 0x364   : > { %3358 = vmatprep.mubr.msk.bf16.mxu1 %vm2348_vm8, %v2333_v2 }
 0x365   : > { %3359 = vmatmul.mubr.msk.bf16.gmra.mrb[4].mxu1 %vm2348_vm8, %v2335_v45 }
 0x368   : > { %v2039_v37 = vpop.permute.xlu1 %2038 }
 0x369   : > { %v2069_v49 = vsel %vm814_vm1, %v3202_v48, %v2039_v37 }
 0x36a   : > { %v2037_v5 = vpop.permute.xlu0 %2036 }
 0x36b   : > { %v2066_v20 = vsel %vm814_vm1, %v3201_v1, %v2037_v5 }
 0x36c   : > { %v2059_v63 = vpop.permute.xlu1 %2058 }
 0x36d   : > { %v2080_v39 = vsel %vm2076_vm5, %v2069_v49, %v2059_v63 }
 0x36e   : > { %v2057_v24 = vpop.permute.xlu0 %2056 }
 0x36f   : > { %v2078_v16 = vsel %vm2076_vm5, %v2066_v20, %v2057_v24 }
 0x370   : > { %3366 = vmatprep.mubr.msk.bf16.mxu1 %vm2348_vm8, %v2078_v16 }
 0x371   : > { %3367 = vmatmul.mubr.msk.bf16.vlgmr.msra.gmra.mrb[0].mxu1 %vm2348_vm8, %v2080_v39 }
 0x372   : > { %3375 = vmatpush3.bf16.msra.mxu1 %v3544_v3 }
 0x373   : > { %v2043_v55 = vpop.permute.xlu1 %2042  ;;  %3423 = vmatprep.subr.msk.bf16.mxu1 %vm2357_vm4, %v3547_v15 }
 0x374   : > { %v2075_v12 = vsel %vm814_vm1, %v3204_v59, %v2043_v55 }
 0x376   : > { %3377 = vmatpush3.bf16.msra.mxu1 %v2781_v30  ;;  %v2041_v60 = vpop.permute.xlu0 %2040 }
 0x377   : > { %v2063_v50 = vpop.permute.xlu1 %2062  ;;  %v2072_v34 = vsel %vm814_vm1, %v3203_v14, %v2041_v60  ;;  %v3557_v14 = vld [vmem:[#allocation3 + $0x48] sm:$0xf] }
 0x378   : > { %v2084_v40 = vsel %vm2076_vm5, %v2075_v12, %v2063_v50  ;;  %v3256_v47 = vcombine.low %v4945_v41, %v3557_v14 }
 0x37a   : > { %v2061_v52 = vpop.permute.xlu0 %2060 }
 0x37b   : > { %v2082_v33 = vsel %vm2076_vm5, %v2072_v34, %v2061_v52 }
 0x37c   : > { %3370 = vmatprep.mubr.msk.bf16.mxu1 %vm2348_vm8, %v2082_v33 }
 0x37d   : > { %3371 = vmatmul.mubr.msk.bf16.gmra.mrb[4].mxu1 %vm2348_vm8, %v2084_v40 }
 0x37f   : > { %v2715_v53 = vpop.permute.xlu1 %2714 }
 0x380   : > { %v2745_v58 = vsel %vm814_vm1, %v3254_v46, %v2715_v53 }
 0x383   : > { %v2713_v10 = vpop.permute.xlu0 %2712  ;;  %v2735_v35 = vpop.permute.xlu1 %2734 }
 0x384   : > { %v2742_v23 = vsel %vm814_vm1, %v3253_v26, %v2713_v10  ;;  %v2755_v22 = vsel %vm2076_vm5, %v2745_v58, %v2735_v35 }
 0x387   : > { %v2733_v44 = vpop.permute.xlu0 %2732 }
 0x388   : > { %v2753_v51 = vsel %vm2076_vm5, %v2742_v23, %v2733_v44 }
 0x389   : > { %3378 = vmatprep.mubr.msk.bf16.mxu1 %vm2348_vm8, %v2753_v51 }
 0x38a   : > { %3379 = vmatmul.mubr.msk.bf16.vlgmr.msra.gmra.mrb[0].mxu1 %vm2348_vm8, %v2755_v22  ;;  %v2719_v48 = vpop.permute.xlu1 %2718 }
 0x38b   : > { %v2751_v46 = vsel %vm814_vm1, %v3256_v47, %v2719_v48 }
 0x38e   : > { %v2717_v59 = vpop.permute.xlu0 %2716  ;;  %v2739_v54 = vpop.permute.xlu1 %2738 }
 0x38f   : > { %v2748_v27 = vsel %vm814_vm1, %v3255_v43, %v2717_v59  ;;  %v2759_v7 = vsel %vm2076_vm5, %v2751_v46, %v2739_v54 }
 0x392   : > { %v2737_v13 = vpop.permute.xlu0 %2736 }
 0x393   : > { %v2757_v26 = vsel %vm2076_vm5, %v2748_v27, %v2737_v13 }
 0x394   : > { %3382 = vmatprep.mubr.msk.bf16.mxu1 %vm2348_vm8, %v2757_v26 }
 0x395   : > { %3383 = vmatmul.mubr.msk.bf16.gmra.mrb[4].mxu1 %vm2348_vm8, %v2759_v7 }
 0x45d   : > { %v3380_v61 = vpop.f32.mrb[0].mxu1 }
 0x45e   : > { %v2817_v41 = vpop.f32.mrb[1].mxu1  ;;  %v5081_v28 = vadd.f32 %v3380_v61, %v3271_v11 }
 0x45f   : > { %v5083_v36 = vadd.f32 %v3271_v11, %v2817_v41  ;;  %v3381_v0 = vpop.f32.mrb[2].mxu1 }
 0x460   : > { %v2820_v62 = vpop.f32.mrb[3].mxu1  ;;  %v5087_v32 = vadd.f32 %v3381_v0, %v3271_v11  ;;  %v2894_v29 = vmul.f32 %v5081_v28, %v5081_v28  ;;  %v2873_v17 = vsel %vm814_vm1, %v5081_v28, 0.0 }
 0x461   : > { %v2892_v43 = vmul.f32 %v5083_v36, %v5083_v36  ;;  %v5089_v6 = vadd.f32 %v3271_v11, %v2820_v62  ;;  %v2870_v57 = vsel %vm814_vm1, %v5083_v36, 0.0 }
 0x462   : > { %v2895_v38 = vmul.f32 %v5087_v32, %v5087_v32  ;;  %v2903_v19 = vsel %vm814_vm1, %v2894_v29, 0.0  ;;  %v2875_v9 = vsel %vm814_vm1, %v5087_v32, 0.0 }
 0x463   : > { %v2871_v25 = vsel %vm814_vm1, %v5089_v6, 0.0  ;;  %v2893_v42 = vmul.f32 %v5089_v6, %v5089_v6  ;;  %v2900_v8 = vsel %vm814_vm1, %v2892_v43, 0.0 }
 0x464   : > { %v2872_v18 = vadd.f32 %v2871_v25, %v2870_v57  ;;  %v2905_v37 = vsel %vm814_vm1, %v2895_v38, 0.0 }
 0x465   : > { %v2901_v3 = vsel %vm814_vm1, %v2893_v42, 0.0 }
 0x466   : > { %v2874_v4 = vadd.f32 %v2873_v17, %v2872_v18  ;;  %v2902_v31 = vadd.f32 %v2901_v3, %v2900_v8 }
 0x468   : > { %v2904_v21 = vadd.f32 %v2903_v19, %v2902_v31  ;;  %v3384_v2 = vpop.f32.mrb[4].mxu1  ;;  %v2876_v45 = vadd.f32 %v2875_v9, %v2874_v4 }
 0x469   : > { %v2833_v5 = vpop.f32.mrb[5].mxu1  ;;  %v5109_v56 = vadd.f32 %v3384_v2, %v3271_v11 }
 0x46a   : > { %v5111_v1 = vadd.f32 %v3271_v11, %v2833_v5  ;;  %v2906_v63 = vadd.f32 %v2905_v37, %v2904_v21  ;;  %v3385_v20 = vpop.f32.mrb[6].mxu1 }
 0x46b   : > { %v2836_v24 = vpop.f32.mrb[7].mxu1  ;;  %v2869_v15 = vadd.f32 %v3385_v20, %v3271_v11  ;;  %v2898_v30 = vmul.f32 %v5109_v56, %v5109_v56  ;;  %v2881_v33 = vsel %vm814_vm1, %v5109_v56, 0.0 }
 0x46c   : > { %v2877_v49 = vsel %vm814_vm1, %v5111_v1, 0.0  ;;  %v2896_v16 = vmul.f32 %v5111_v1, %v5111_v1  ;;  %v2867_v39 = vadd.f32 %v3271_v11, %v2836_v24 }
 0x46d   : > { %v2878_v55 = vadd.f32 %v2877_v49, %v2876_v45  ;;  %v2899_v40 = vmul.f32 %v2869_v15, %v2869_v15  ;;  %v2911_v23 = vsel %vm814_vm1, %v2898_v30, 0.0  ;;  %v2883_v44 = vsel %vm814_vm1, %v2869_v15, 0.0 }
 0x46e   : > { %v2907_v60 = vsel %vm814_vm1, %v2896_v16, 0.0  ;;  %v2879_v50 = vsel %vm814_vm1, %v2867_v39, 0.0  ;;  %v2897_v34 = vmul.f32 %v2867_v39, %v2867_v39 }
 0x46f   : > { %v2908_v52 = vadd.f32 %v2907_v60, %v2906_v63  ;;  %v2880_v12 = vadd.f32 %v2879_v50, %v2878_v55  ;;  %v2913_v22 = vsel %vm814_vm1, %v2899_v40, 0.0 }
 0x470   : > { %v2909_v53 = vsel %vm814_vm1, %v2897_v34, 0.0 }
 0x471   : > { %v2882_v10 = vadd.f32 %v2881_v33, %v2880_v12  ;;  %v2910_v35 = vadd.f32 %v2909_v53, %v2908_v52 }
 0x473   : > { %v2884_v58 = vadd.f32 %v2883_v44, %v2882_v10  ;;  %v2912_v51 = vadd.f32 %v2911_v23, %v2910_v35 }
 0x475   : > { %v2885_v48 = vrot.slane %v2884_v58, 4  ;;  %v2914_v59 = vadd.f32 %v2913_v22, %v2912_v51 }
 0x477   : > { %v2886_v14 = vadd.f32 %v2885_v48, %v2884_v58  ;;  %v2915_v47 = vrot.slane %v2914_v59, 4 }
 0x479   : > { %v2887_v54 = vrot.slane %v2886_v14, 2  ;;  %v2916_v27 = vadd.f32 %v2915_v47, %v2914_v59 }
 0x47b   : > { %v2888_v13 = vadd.f32 %v2887_v54, %v2886_v14  ;;  %v2917_v46 = vrot.slane %v2916_v27, 2 }
 0x47d   : > { %v2889_v26 = vrot.slane %v2888_v13, 1  ;;  %v2918_v7 = vadd.f32 %v2917_v46, %v2916_v27 }
 0x47f   : > { %v2890_v11 = vadd.f32 %v2889_v26, %v2888_v13  ;;  %v2919_v61 = vrot.slane %v2918_v7, 1 }
 0x481   : > { %v2891_v41 = vmul.f32 0.015625, %v2890_v11  ;;  %v2920_v0 = vadd.f32 %v2919_v61, %v2918_v7 }
 0x483   : > { %v2921_v62 = vmul.f32 0.015625, %v2920_v0  ;;  %v2922_v43 = vmul.f32 %v2891_v41, %v2891_v41  ;;  %v2925_v29 = vsub.f32 %v5083_v36, %v2891_v41  ;;  %v2926_v57 = vsub.f32 %v5089_v6, %v2891_v41 }
 0x484   : > { %v2927_v25 = vsub.f32 %v5081_v28, %v2891_v41  ;;  %v2928_v42 = vsub.f32 %v5087_v32, %v2891_v41  ;;  %v2929_v18 = vsub.f32 %v5111_v1, %v2891_v41  ;;  %v2930_v17 = vsub.f32 %v2867_v39, %v2891_v41 }
 0x485   : > { %v2923_v8 = vsub.f32 %v2921_v62, %v2922_v43  ;;  %v2931_v38 = vsub.f32 %v5109_v56, %v2891_v41  ;;  %v2932_v3 = vsub.f32 %v2869_v15, %v2891_v41 }
 0x487   : > { %v2924_v4 = vmax.f32 %v2923_v8, 0.0 }
 0x489   : > { %v2933_v31 = vadd.f32 1e-05, %v2924_v4 }
 0x48b   : > { %3552 = vrsqrt.f32 %v2933_v31 }
 0x495   : > { %v3553_v19 = vpop.eup %3552 }
 0x496   : > { %v2940_v36 = vmul.f32 %v3553_v19, %v2930_v17  ;;  %v2935_v9 = vmul.f32 %v3553_v19, %v2925_v29  ;;  %v2936_v6 = vmul.f32 %v3553_v19, %v2926_v57  ;;  %v2937_v21 = vmul.f32 %v3553_v19, %v2927_v25 }
 0x497   : > { %v2938_v28 = vmul.f32 %v3553_v19, %v2928_v42  ;;  %v2939_v32 = vmul.f32 %v3553_v19, %v2929_v18  ;;  %v2941_v2 = vmul.f32 %v3553_v19, %v2931_v38  ;;  %v2942_v45 = vmul.f32 %v3553_v19, %v2932_v3 }
 0x498   : > { %v2948_v37 = vmax.f32 %v2940_v36, 0.0  ;;  %v2943_v5 = vmax.f32 %v2935_v9, 0.0  ;;  %v2944_v56 = vmax.f32 %v2936_v6, 0.0  ;;  %v2945_v1 = vmax.f32 %v2937_v21, 0.0 }
 0x499   : > { %v2946_v63 = vmax.f32 %v2938_v28, 0.0  ;;  %v2947_v20 = vmax.f32 %v2939_v32, 0.0  ;;  %v2949_v24 = vmax.f32 %v2941_v2, 0.0  ;;  %v2950_v49 = vmax.f32 %v2942_v45, 0.0 }
 0x49a   : > { %2956 = vst.msk [vmem:[%s296_s6 + $0x28] sm:$0xff] %vm814_vm1, %v2948_v37  ;;  %2951 = vst.msk [vmem:[%s296_s6] sm:$0xff] %vm814_vm1, %v2943_v5 }
 0x49b   : > { %2952 = vst.msk [vmem:[%s296_s6 + $0x8] sm:$0xff] %vm814_vm1, %v2944_v56  ;;  %2953 = vst.msk [vmem:[%s296_s6 + $0x10] sm:$0xff] %vm814_vm1, %v2945_v1 }
 0x49c   : > { %2954 = vst.msk [vmem:[%s296_s6 + $0x18] sm:$0xff] %vm814_vm1, %v2946_v63  ;;  %2955 = vst.msk [vmem:[%s296_s6 + $0x20] sm:$0xff] %vm814_vm1, %v2947_v20 }
 0x49d   : > { %2957 = vst.msk [vmem:[%s296_s6 + $0x30] sm:$0xff] %vm814_vm1, %v2949_v24  ;;  %2958 = vst.msk [vmem:[%s296_s6 + $0x38] sm:$0xff] %vm814_vm1, %v2950_v49 }
 0x49e   : > { %3713 = shalt.err (!%p3710_p13)
}
 0x49f   : > { %s3714_s28 = scalar_lea.hbm %s5139_s22, 1024  ;;  %s3718_s27 = scalar_lea.hbm %s5199_s5, 2048 }
 0x4a0   : > { %p3715_p9 = scmp.ne.s32.totalorder %s5139_s22, %s3714_s28  ;;  %p3719_p6 = scmp.lt.u32.totalorder %s5139_s22, %s5199_s5 }
 0x4a1   : > { %p3720_p4 = scmp.lt.u32.totalorder %s3718_s27, %s3714_s28  ;;  %p3722_p3 = scmp.lt.u32.totalorder %s3714_s28, %s5139_s22 }
 0x4a2   : > { %p3716_p0 = pnand %p3715_p9, %p3985_p10 }
 0x4a3   : > { %p3721_p8 = por %p3720_p4, %p3719_p6 }
 0x4a4   : > { %p3717_p11 = pneg %p3716_p0 }
 0x4a5   : > { %p3723_p5 = por %p3722_p3, %p3721_p8 }
 0x4a7   : > { %p3724_p7 = pnand %p3723_p5, %p3717_p11 }
 0x4a9   : > { %3727 = shalt.err (!%p3724_p7)
}
 0x4aa   : > { %s3789_s15 = smov 128  }
 0x4ab   : > { %3442 = dma.vmem_to_hbm [thread:$0]  (%p3985_p10), %s5141_s17, 1024, %s5139_s22, %s2960_s8, %s3789_s15, %s3789_s15, %s3786_s23  }
 0x4ac PF: > { %s2988_s11 = sand.u32 1, %s3762_s18   ;;  %p5233_p12 = scmp.ne.s32.totalorder %s5204_s25, 0 }
 0x4ad   : > { %p5234_p1 = scmp.ge.s32.totalorder %s3774_s21, 2  ;;  %s2989_s29 = scalar_lea.sflag [#allocation6], %s2988_s11 }
 0x4af   : > { %p3462_p2 = pnand %p5234_p1, %p5233_p12 }
 0x4b1   : > { %3757 = dma.done.wait (!%p3462_p2), %s2989_s29, 1024  }
 0x4b2   : > { %3759 = vsyncadd (!%p3462_p2), %s2989_s29, 4294966272  ;;  %p20_p13 = scmp.ge.s32.totalorder %s3975_s14, 4   ;;  %s5235_s18 = smov %s3766_s19 }
 0x4b3   : > { %s5236_s19 = smov %s3770_s20  ;;  %s5237_s20 = smov %s3991_s10 }
 0x4b4   : > { %s5238_s21 = smov %s3975_s14  ;;  %22 = sbr.rel (!%p20_p13) target bundleno = 7 (0x7), region = 108 }
 0x4bb   :  { %2994 = vsyncpa [#allocation5], 1 }
 0x4bc   :  { %2996 = vsyncpa [#allocation5 + $0x1], 1 }
 0x4bd   :  { %2997 = vsyncpa [#allocation8], 1 }
 0x4be   :  { %2998 = vsyncpa [#allocation11], 1 }
 0x4bf   :  { %2999 = vsyncpa [#allocation6], 1 }
 0x4c0   :  { %3001 = vsyncpa [#allocation6 + $0x1], 1 }

</bundles_post_ra>
